<compile_context>
chip_gen: v5e
topology: v5e:2x2
jax: 0.10.0
libtpu: 0.0.40
codegen_flags: <defaults>
</compile_context>

<pallas_src>
import functools

import jax
import jax.numpy as jnp
from jax.experimental import pallas as pl
from jax.experimental.pallas import tpu as pltpu

_EPS = 1e-5  # nn.BatchNorm2d default eps


def _round_up(x, m):
    return ((x + m - 1) // m) * m


def _vmem_limit_bytes():
    # ~3/4 of physical VMEM (96 MiB on v5e/v6e's 128 MiB), conservative 48 MiB
    # fallback (covers v7x's 64 MiB and any query failure).
    try:
        cap = int(pltpu.get_tpu_info().vmem_capacity_bytes)
    except Exception:
        cap = 64 * 1024 * 1024
    return int(min(cap * 3 // 4, 100 * 1024 * 1024))


def _pass2_row_tile(m, cap=8192):
    if m <= cap:
        return m
    for d in range(cap - cap % 8, 7, -8):   # largest multiple-of-8 divisor
        if m % d == 0:
            return d
    return m  # pathological shapes: fall back to a single block (still correct)


def _fold_upsample_weights(w):
    """Fold nearest-2x upsample + 3x3 conv (pad 1) into 9-tap im2col weights.

    w: (3, 3, Cin, Cout) -> (3, 3, Cin, 2, 2, Cout).  Tap (ry, rx) multiplies
    xp[a+ry, b+rx] (xp = x zero-padded by 1) and (p, q) selects the sub-pixel:
    out[2a+p, 2b+q] of conv3x3(upsample2x(x)).  Only 4 of 9 taps are non-zero
    per (p, q); the zeros ride along so the whole conv is one MXU matmul with
    K = 9*Cin and N = 4*Cout.
    """
    cin, cout = w.shape[2], w.shape[3]
    k = jnp.zeros((3, 3, cin, 2, 2, cout), w.dtype)
    for p in range(2):
        for q in range(2):
            for ky in range(3):
                ry = (p + ky - 1) // 2 + 1
                for kx in range(3):
                    rx = (q + kx - 1) // 2 + 1
                    k = k.at[ry, rx, :, p, q, :].add(w[ky, kx])
    return k


# ----------------------------- Pallas kernels ------------------------------

def _upconv_conv_kernel(x_ref, k_ref, b_ref, y_ref, sum_ref, ssq_ref, *,
                        valid_rows):
    # x_ref  : (1, RP+2, W+2, Cin_p) bf16 — padded image of one batch element
    #          (resident across the row-block axis; DMA'd once per batch elem).
    # k_ref  : (9*Cin_p, 4*Cout)     bf16 — folded im2col weights.
    # b_ref  : (1, 4*Cout)           f32  — conv bias tiled over the 4 sub-pixels.
    # y_ref  : (1, TRI, W, 4*Cout)   bf16 — conv+bias output, (p,q,c) on lanes.
    # sum_ref/ssq_ref: (1, 1, 4*Cout) f32 — per-block partial BN statistics of
    #          the pre-bias activation (bias removed -> better conditioning).
    _, tri, w_out, _ = y_ref.shape
    cin_p = x_ref.shape[-1]
    row0 = pl.program_id(1) * tri

    # One haloed row-block load, then 9 statically shifted windows concatenated
    # along lanes (Cin_p is a multiple of 128 -> aligned concat / reshape).
    xin = x_ref[0, pl.ds(row0, tri + 2), :, :]                 # (TRI+2, W+2, Cin_p)
    parts = [xin[dy:dy + tri, dx:dx + w_out, :]
             for dy in range(3) for dx in range(3)]
    lhs = jnp.concatenate(parts, axis=-1).reshape(tri * w_out, 9 * cin_p)

    # Single MXU matmul: M = TRI*W, K = 9*Cin_p, N = 4*Cout, f32 accumulation.
    dotv = jnp.dot(lhs, k_ref[...], preferred_element_type=jnp.float32)

    y_ref[0] = (dotv + b_ref[...]).reshape(tri, w_out, -1).astype(y_ref.dtype)

    # Partial BN sums over rows that map to real (unpadded) output rows.
    nvalid = jnp.minimum(valid_rows - row0, tri)
    flat_row = jax.lax.broadcasted_iota(jnp.int32, (tri * w_out, 1), 0)
    d = jnp.where(flat_row < nvalid * w_out, dotv, 0.0)
    sum_ref[0] = jnp.sum(d, axis=0, keepdims=True)
    ssq_ref[0] = jnp.sum(d * d, axis=0, keepdims=True)


def _bn_relu_kernel(y_ref, scale_ref, shift_ref, o_ref):
    # Elementwise (y - mean) * rsqrt(var + eps) folded into y*scale + shift, ReLU.
    y = y_ref[...].astype(jnp.float32)
    o_ref[...] = jnp.maximum(y * scale_ref[...] + shift_ref[...], 0.0)


# ------------------------------ module forward ------------------------------

def up_conv_forward(x_nchw, params):
    """up_conv forward: NCHW in, NCHW out (PyTorch convention)."""
    w = params["w"]                       # (3, 3, Cin, Cout)
    b = params["b"]                       # (Cout,)
    n, cin, h, wd = x_nchw.shape
    cout = w.shape[-1]
    c4 = 4 * cout

    # ---- tiling choices ------------------------------------------------------
    cin_p = _round_up(cin, 128)                          # lane-aligned K pieces
    tri = max(1, min(h, pl.cdiv(512, max(wd, 1))))       # matmul M ~ 256-512 rows
    rb = pl.cdiv(h, tri)
    rows_p = rb * tri                                    # tail rows masked in BN

    # ---- host-side layout prep (cheap; fused by XLA) -------------------------
    x = jnp.transpose(x_nchw, (0, 2, 3, 1))
    xp = jnp.pad(x, ((0, 0), (1, 1 + rows_p - h), (1, 1), (0, cin_p - cin)))
    xp = xp.astype(jnp.bfloat16)
    keff = _fold_upsample_weights(w)                     # (3,3,Cin,2,2,Cout)
    keff = jnp.pad(keff, ((0, 0), (0, 0), (0, cin_p - cin),
                          (0, 0), (0, 0), (0, 0)))
    keff = keff.reshape(9 * cin_p, c4).astype(jnp.bfloat16)
    bias4 = jnp.tile(b, 4).reshape(1, c4).astype(jnp.float32)

    vmem = _vmem_limit_bytes()

    # ---- pass 1: fused upsample+conv+bias, emitting partial BN statistics ----
    y, psum, psq = pl.pallas_call(
        functools.partial(_upconv_conv_kernel, valid_rows=h),
        grid=(n, rb),
        in_specs=[
            # Whole padded image of one batch element stays resident across the
            # row-block axis (index map ignores r -> fetched once per batch).
            # TODO(synk): for large H*W*Cin switch this to a haloed row-block
            # manual DMA (make_async_copy) so VMEM stays bounded on v7x (64 MiB).
            pl.BlockSpec((1, rows_p + 2, wd + 2, cin_p),
                         lambda i, r: (i, 0, 0, 0)),
            pl.BlockSpec((9 * cin_p, c4), lambda i, r: (0, 0)),
            pl.BlockSpec((1, c4), lambda i, r: (0, 0)),
        ],
        out_specs=(
            pl.BlockSpec((1, tri, wd, c4), lambda i, r: (i, r, 0, 0)),
            pl.BlockSpec((1, 1, c4), lambda i, r: (i * rb + r, 0, 0)),
            pl.BlockSpec((1, 1, c4), lambda i, r: (i * rb + r, 0, 0)),
        ),
        out_shape=(
            jax.ShapeDtypeStruct((n, rows_p, wd, c4), jnp.bfloat16),
            jax.ShapeDtypeStruct((n * rb, 1, c4), jnp.float32),
            jax.ShapeDtypeStruct((n * rb, 1, c4), jnp.float32),
        ),
        compiler_params=pltpu.CompilerParams(
            dimension_semantics=("parallel", "parallel"),
            vmem_limit_bytes=vmem),
    )(xp, keff, bias4)

    # ---- finalize training-mode BatchNorm statistics on tiny (Cout,) arrays --
    cnt = jnp.float32(n * h * wd * 4)                    # == N * (2H) * (2W)
    s = jnp.sum(psum.reshape(-1, 4, cout), axis=(0, 1))
    ss = jnp.sum(psq.reshape(-1, 4, cout), axis=(0, 1))
    mean_d = s / cnt                                     # pre-bias mean
    var = jnp.maximum(ss / cnt - mean_d * mean_d, 0.0)   # biased variance
    scale = jax.lax.rsqrt(var + _EPS)                    # gamma = 1 (default init)
    shift = -(mean_d + b) * scale                        # beta  = 0 (default init)
    scale4 = jnp.tile(scale, 4).reshape(1, c4)
    shift4 = jnp.tile(shift, 4).reshape(1, c4)

    # ---- pass 2: lane-dense elementwise normalize + ReLU ---------------------
    m2 = n * rows_p * wd
    tm2 = _pass2_row_tile(m2)
    out_cl = pl.pallas_call(
        _bn_relu_kernel,
        grid=(m2 // tm2,),
        in_specs=[
            pl.BlockSpec((tm2, c4), lambda i: (i, 0)),
            pl.BlockSpec((1, c4), lambda i: (0, 0)),
            pl.BlockSpec((1, c4), lambda i: (0, 0)),
        ],
        out_specs=pl.BlockSpec((tm2, c4), lambda i: (i, 0)),
        out_shape=jax.ShapeDtypeStruct((m2, c4), jnp.float32),
        compiler_params=pltpu.CompilerParams(
            dimension_semantics=("parallel",),
            vmem_limit_bytes=vmem),
    )(y.reshape(m2, c4), scale4, shift4)

    # ---- (p,q,c)-on-lanes -> NCHW at the module boundary (pure layout). ------
    # TODO(synk): a channels-last consumer can take out_cl directly and skip
    # this transpose (one extra HBM read+write of the f32 output).
    out = out_cl.reshape(n, rows_p, wd, 2, 2, cout)[:, :h]
    return out.transpose(0, 5, 1, 3, 2, 4).reshape(n, cout, 2 * h, 2 * wd)


# ------------------------------ pure-JAX reference ---------------------------

def _reference_up_conv(x_nchw, params):
    w, b = params["w"], params["b"]
    x = jnp.transpose(x_nchw, (0, 2, 3, 1))
    u = jnp.repeat(jnp.repeat(x, 2, axis=1), 2, axis=2)
    y = jax.lax.conv_general_dilated(
        u, w, window_strides=(1, 1), padding="SAME",
        dimension_numbers=("NHWC", "HWIO", "NHWC"),
        precision=jax.lax.Precision.HIGHEST) + b
    mean = jnp.mean(y, axis=(0, 1, 2), keepdims=True)
    var = jnp.mean(jnp.square(y - mean), axis=(0, 1, 2), keepdims=True)
    y = jnp.maximum((y - mean) * jax.lax.rsqrt(var + _EPS), 0.0)
    return jnp.transpose(y, (0, 3, 1, 2))


# ----------------------------------- main -----------------------------------

if __name__ == "__main__":
    N, CH_IN, CH_OUT, H, W = 2, 64, 32, 16, 16

    key = jax.random.PRNGKey(0)
    kw, kb, kx = jax.random.split(key, 3)
    bound = 1.0 / jnp.sqrt(jnp.float32(9 * CH_IN))   # PyTorch Conv2d default bound
    params = {
        "w": jax.random.uniform(kw, (3, 3, CH_IN, CH_OUT), jnp.float32, -bound, bound),
        "b": jax.random.uniform(kb, (CH_OUT,), jnp.float32, -bound, bound),
    }
    x = jax.random.normal(kx, (N, CH_IN, H, W), dtype=jnp.float32)

    fwd = jax.jit(up_conv_forward)
    out = jax.block_until_ready(fwd(x, params))

    assert out.shape == (N, CH_OUT, 2 * H, 2 * W), out.shape
    assert bool(jnp.all(jnp.isfinite(out)))

    ref = _reference_up_conv(x, params)
    err = float(jnp.max(jnp.abs(out - ref)))
    assert err < 5e-2, f"max abs error vs reference: {err}"

    print("KERNEL_OK")
</pallas_src>

<mosaic_0001>
module attributes {stable_mosaic.version = 11 : i64} {
  func.func @_upconv_conv_kernel(%arg0: i32, %arg1: i32, %arg2: memref<1x18x18x128xbf16, #tpu.memory_space<vmem>>, %arg3: memref<1152x128xbf16, #tpu.memory_space<vmem>>, %arg4: memref<1x128xf32, #tpu.memory_space<vmem>>, %arg5: memref<1x16x16x128xbf16, #tpu.memory_space<vmem>>, %arg6: memref<1x1x128xf32, #tpu.memory_space<vmem>>, %arg7: memref<1x1x128xf32, #tpu.memory_space<vmem>>) attributes {dimension_semantics = [#tpu.dimension_semantics<parallel>, #tpu.dimension_semantics<parallel>], iteration_bounds = array<i64: 2, 1>, scalar_prefetch = 0 : i64, scratch_operands = 0 : i64, tpu.core_type = #tpu.core_type<tc>, window_params = [{transform_indices = @transform_0, window_bounds = array<i64: 1, 18, 18, 128>}, {pipeline_mode = #tpu.pipeline_mode<synchronous>, transform_indices = @transform_1, window_bounds = array<i64: 1152, 128>}, {pipeline_mode = #tpu.pipeline_mode<synchronous>, transform_indices = @transform_2, window_bounds = array<i64: 1, 128>}, {transform_indices = @transform_3, window_bounds = array<i64: 1, 16, 16, 128>}, {transform_indices = @transform_4, window_bounds = array<i64: 1, 1, 128>}, {transform_indices = @transform_5, window_bounds = array<i64: 1, 1, 128>}]} {
    %c16_i32 = arith.constant 16 : i32
    %0 = arith.muli %arg1, %c16_i32 : i32
    %c0 = arith.constant 0 : index
    %1 = arith.index_cast %0 : i32 to index
    %c0_0 = arith.constant 0 : index
    %c0_1 = arith.constant 0 : index
    %2 = vector.load %arg2[%c0, %1, %c0_0, %c0_1] : memref<1x18x18x128xbf16, #tpu.memory_space<vmem>>, vector<1x18x18x128xbf16>
    %3 = vector.shape_cast %2 : vector<1x18x18x128xbf16> to vector<18x18x128xbf16>
    %4 = vector.extract_strided_slice %3 {offsets = [0, 0, 0], sizes = [16, 16, 128], strides = [1, 1, 1]} : vector<18x18x128xbf16> to vector<16x16x128xbf16>
    %5 = vector.extract_strided_slice %3 {offsets = [0, 1, 0], sizes = [16, 16, 128], strides = [1, 1, 1]} : vector<18x18x128xbf16> to vector<16x16x128xbf16>
    %6 = vector.extract_strided_slice %3 {offsets = [0, 2, 0], sizes = [16, 16, 128], strides = [1, 1, 1]} : vector<18x18x128xbf16> to vector<16x16x128xbf16>
    %7 = vector.extract_strided_slice %3 {offsets = [1, 0, 0], sizes = [16, 16, 128], strides = [1, 1, 1]} : vector<18x18x128xbf16> to vector<16x16x128xbf16>
    %8 = vector.extract_strided_slice %3 {offsets = [1, 1, 0], sizes = [16, 16, 128], strides = [1, 1, 1]} : vector<18x18x128xbf16> to vector<16x16x128xbf16>
    %9 = vector.extract_strided_slice %3 {offsets = [1, 2, 0], sizes = [16, 16, 128], strides = [1, 1, 1]} : vector<18x18x128xbf16> to vector<16x16x128xbf16>
    %10 = vector.extract_strided_slice %3 {offsets = [2, 0, 0], sizes = [16, 16, 128], strides = [1, 1, 1]} : vector<18x18x128xbf16> to vector<16x16x128xbf16>
    %11 = vector.extract_strided_slice %3 {offsets = [2, 1, 0], sizes = [16, 16, 128], strides = [1, 1, 1]} : vector<18x18x128xbf16> to vector<16x16x128xbf16>
    %12 = vector.extract_strided_slice %3 {offsets = [2, 2, 0], sizes = [16, 16, 128], strides = [1, 1, 1]} : vector<18x18x128xbf16> to vector<16x16x128xbf16>
    %13 = tpu.concatenate %4, %5, %6, %7, %8, %9, %10, %11, %12 in 2 : vector<16x16x128xbf16>, vector<16x16x128xbf16>, vector<16x16x128xbf16>, vector<16x16x128xbf16>, vector<16x16x128xbf16>, vector<16x16x128xbf16>, vector<16x16x128xbf16>, vector<16x16x128xbf16>, vector<16x16x128xbf16> -> vector<16x16x1152xbf16>
    %14 = vector.shape_cast %13 : vector<16x16x1152xbf16> to vector<256x1152xbf16>
    %c0_2 = arith.constant 0 : index
    %c0_3 = arith.constant 0 : index
    %15 = vector.load %arg3[%c0_2, %c0_3] : memref<1152x128xbf16, #tpu.memory_space<vmem>>, vector<1152x128xbf16>
    %cst = arith.constant dense<0.000000e+00> : vector<256x128xf32>
    %16 = tpu.matmul %14, %15, %cst {dimension_numbers = #tpu.dot_dimension_numbers<[1], [0], [0], [1], [0, 0, 1, 1], [], []>} : vector<256x1152xbf16>, vector<1152x128xbf16>, vector<256x128xf32> -> vector<256x128xf32>
    %c0_4 = arith.constant 0 : index
    %c0_5 = arith.constant 0 : index
    %17 = vector.load %arg4[%c0_4, %c0_5] : memref<1x128xf32, #tpu.memory_space<vmem>>, vector<1x128xf32>
    %18 = vector.broadcast %17 : vector<1x128xf32> to vector<256x128xf32>
    %19 = arith.addf %16, %18 : vector<256x128xf32>
    %20 = vector.shape_cast %19 : vector<256x128xf32> to vector<16x16x128xf32>
    %21 = arith.truncf %20 : vector<16x16x128xf32> to vector<16x16x128xbf16>
    %c0_6 = arith.constant 0 : index
    %c0_7 = arith.constant 0 : index
    %c0_8 = arith.constant 0 : index
    %c0_9 = arith.constant 0 : index
    %22 = vector.load %arg5[%c0_6, %c0_7, %c0_8, %c0_9] : memref<1x16x16x128xbf16, #tpu.memory_space<vmem>>, vector<1x16x16x128xbf16>
    %23 = vector.shape_cast %22 : vector<1x16x16x128xbf16> to vector<16x16x128xbf16>
    %24 = vector.shape_cast %21 : vector<16x16x128xbf16> to vector<1x16x16x128xbf16>
    tpu.vector_store %arg5[%c0_6, %c0_7, %c0_8, %c0_9], %24 {strides = array<i32>} : memref<1x16x16x128xbf16, #tpu.memory_space<vmem>>, vector<1x16x16x128xbf16>,
    %c16_i32_10 = arith.constant 16 : i32
    %25 = arith.subi %c16_i32_10, %0 : i32
    %c16_i32_11 = arith.constant 16 : i32
    %26 = arith.minsi %25, %c16_i32_11 : i32
    %27 = tpu.iota {dimensions = array<i32: 0>} : vector<256x1xi32>
    %c16_i32_12 = arith.constant 16 : i32
    %28 = arith.muli %26, %c16_i32_12 : i32
    %29 = vector.broadcast %28 : i32 to vector<256x1xi32>
    %30 = arith.cmpi slt, %27, %29 : vector<256x1xi32>
    %cst_13 = arith.constant 0.000000e+00 : f32
    %31 = vector.shape_cast %30 : vector<256x1xi1> to vector<256x1xi1>
    %32 = vector.broadcast %31 : vector<256x1xi1> to vector<256x128xi1>
    %33 = vector.broadcast %cst_13 : f32 to vector<256x128xf32>
    %34 = arith.select %32, %16, %33 : vector<256x128xi1>, vector<256x128xf32>
    %cst_14 = arith.constant dense<0.000000e+00> : vector<128xf32>
    %35 = vector.multi_reduction <add>, %34, %cst_14 [0] : vector<256x128xf32> to vector<128xf32>
    %36 = vector.shape_cast %35 : vector<128xf32> to vector<1x128xf32>
    %c0_15 = arith.constant 0 : index
    %c0_16 = arith.constant 0 : index
    %c0_17 = arith.constant 0 : index
    %37 = vector.load %arg6[%c0_15, %c0_16, %c0_17] : memref<1x1x128xf32, #tpu.memory_space<vmem>>, vector<1x1x128xf32>
    %38 = vector.shape_cast %37 : vector<1x1x128xf32> to vector<1x128xf32>
    %39 = vector.shape_cast %36 : vector<1x128xf32> to vector<1x1x128xf32>
    tpu.vector_store %arg6[%c0_15, %c0_16, %c0_17], %39 {strides = array<i32>} : memref<1x1x128xf32, #tpu.memory_space<vmem>>, vector<1x1x128xf32>,
    %40 = arith.mulf %34, %34 : vector<256x128xf32>
    %cst_18 = arith.constant dense<0.000000e+00> : vector<128xf32>
    %41 = vector.multi_reduction <add>, %40, %cst_18 [0] : vector<256x128xf32> to vector<128xf32>
    %42 = vector.shape_cast %41 : vector<128xf32> to vector<1x128xf32>
    %c0_19 = arith.constant 0 : index
    %c0_20 = arith.constant 0 : index
    %c0_21 = arith.constant 0 : index
    %43 = vector.load %arg7[%c0_19, %c0_20, %c0_21] : memref<1x1x128xf32, #tpu.memory_space<vmem>>, vector<1x1x128xf32>
    %44 = vector.shape_cast %43 : vector<1x1x128xf32> to vector<1x128xf32>
    %45 = vector.shape_cast %42 : vector<1x128xf32> to vector<1x1x128xf32>
    tpu.vector_store %arg7[%c0_19, %c0_20, %c0_21], %45 {strides = array<i32>} : memref<1x1x128xf32, #tpu.memory_space<vmem>>, vector<1x1x128xf32>,
    return
  }
  func.func @transform_0(%arg0: i32, %arg1: i32) -> (i32, i32, i32, i32) {
    %c0_i32 = arith.constant 0 : i32
    %c0_i32_0 = arith.constant 0 : i32
    %c0_i32_1 = arith.constant 0 : i32
    %c0_i32_2 = arith.constant 0 : i32
    return %arg0, %c0_i32, %c0_i32_0, %c0_i32_1 : i32, i32, i32, i32
  }
  func.func @transform_1(%arg0: i32, %arg1: i32) -> (i32, i32) {
    %c0_i32 = arith.constant 0 : i32
    %c0_i32_0 = arith.constant 0 : i32
    %c0_i32_1 = arith.constant 0 : i32
    return %c0_i32, %c0_i32_0 : i32, i32
  }
  func.func @transform_2(%arg0: i32, %arg1: i32) -> (i32, i32) {
    %c0_i32 = arith.constant 0 : i32
    %c0_i32_0 = arith.constant 0 : i32
    %c0_i32_1 = arith.constant 0 : i32
    return %c0_i32, %c0_i32_0 : i32, i32
  }
  func.func @transform_3(%arg0: i32, %arg1: i32) -> (i32, i32, i32, i32) {
    %c0_i32 = arith.constant 0 : i32
    %c0_i32_0 = arith.constant 0 : i32
    %c0_i32_1 = arith.constant 0 : i32
    return %arg0, %arg1, %c0_i32, %c0_i32_0 : i32, i32, i32, i32
  }
  func.func @transform_4(%arg0: i32, %arg1: i32) -> (i32, i32, i32) {
    %c1_i32 = arith.constant 1 : i32
    %0 = arith.muli %arg0, %c1_i32 : i32
    %1 = arith.addi %0, %arg1 : i32
    %c0_i32 = arith.constant 0 : i32
    %c0_i32_0 = arith.constant 0 : i32
    %c0_i32_1 = arith.constant 0 : i32
    return %1, %c0_i32, %c0_i32_0 : i32, i32, i32
  }
  func.func @transform_5(%arg0: i32, %arg1: i32) -> (i32, i32, i32) {
    %c1_i32 = arith.constant 1 : i32
    %0 = arith.muli %arg0, %c1_i32 : i32
    %1 = arith.addi %0, %arg1 : i32
    %c0_i32 = arith.constant 0 : i32
    %c0_i32_0 = arith.constant 0 : i32
    %c0_i32_1 = arith.constant 0 : i32
    return %1, %c0_i32, %c0_i32_0 : i32, i32, i32
  }
}

module attributes {stable_mosaic.version = 11 : i64} {
  func.func @_bn_relu_kernel(%arg0: i32, %arg1: memref<512x128xbf16, #tpu.memory_space<vmem>>, %arg2: memref<1x128xf32, #tpu.memory_space<vmem>>, %arg3: memref<1x128xf32, #tpu.memory_space<vmem>>, %arg4: memref<512x128xf32, #tpu.memory_space<vmem>>) attributes {dimension_semantics = [#tpu.dimension_semantics<parallel>], iteration_bounds = array<i64: 1>, scalar_prefetch = 0 : i64, scratch_operands = 0 : i64, tpu.core_type = #tpu.core_type<tc>, window_params = [{transform_indices = @transform_0, window_bounds = array<i64: 512, 128>}, {pipeline_mode = #tpu.pipeline_mode<synchronous>, transform_indices = @transform_1, window_bounds = array<i64: 1, 128>}, {pipeline_mode = #tpu.pipeline_mode<synchronous>, transform_indices = @transform_2, window_bounds = array<i64: 1, 128>}, {transform_indices = @transform_3, window_bounds = array<i64: 512, 128>}]} {
    %c0 = arith.constant 0 : index
    %c0_0 = arith.constant 0 : index
    %0 = vector.load %arg1[%c0, %c0_0] : memref<512x128xbf16, #tpu.memory_space<vmem>>, vector<512x128xbf16>
    %1 = arith.extf %0 : vector<512x128xbf16> to vector<512x128xf32>
    %c0_1 = arith.constant 0 : index
    %c0_2 = arith.constant 0 : index
    %2 = vector.load %arg2[%c0_1, %c0_2] : memref<1x128xf32, #tpu.memory_space<vmem>>, vector<1x128xf32>
    %3 = vector.broadcast %2 : vector<1x128xf32> to vector<512x128xf32>
    %4 = arith.mulf %1, %3 : vector<512x128xf32>
    %c0_3 = arith.constant 0 : index
    %c0_4 = arith.constant 0 : index
    %5 = vector.load %arg3[%c0_3, %c0_4] : memref<1x128xf32, #tpu.memory_space<vmem>>, vector<1x128xf32>
    %6 = vector.broadcast %5 : vector<1x128xf32> to vector<512x128xf32>
    %7 = arith.addf %4, %6 : vector<512x128xf32>
    %cst = arith.constant 0.000000e+00 : f32
    %8 = vector.broadcast %cst : f32 to vector<512x128xf32>
    %9 = arith.maximumf %7, %8 : vector<512x128xf32>
    %c0_5 = arith.constant 0 : index
    %c0_6 = arith.constant 0 : index
    %10 = vector.load %arg4[%c0_5, %c0_6] : memref<512x128xf32, #tpu.memory_space<vmem>>, vector<512x128xf32>
    tpu.vector_store %arg4[%c0_5, %c0_6], %9 {strides = array<i32>} : memref<512x128xf32, #tpu.memory_space<vmem>>, vector<512x128xf32>,
    return
  }
  func.func @transform_0(%arg0: i32) -> (i32, i32) {
    %c0_i32 = arith.constant 0 : i32
    %c0_i32_0 = arith.constant 0 : i32
    return %arg0, %c0_i32 : i32, i32
  }
  func.func @transform_1(%arg0: i32) -> (i32, i32) {
    %c0_i32 = arith.constant 0 : i32
    %c0_i32_0 = arith.constant 0 : i32
    %c0_i32_1 = arith.constant 0 : i32
    return %c0_i32, %c0_i32_0 : i32, i32
  }
  func.func @transform_2(%arg0: i32) -> (i32, i32) {
    %c0_i32 = arith.constant 0 : i32
    %c0_i32_0 = arith.constant 0 : i32
    %c0_i32_1 = arith.constant 0 : i32
    return %c0_i32, %c0_i32_0 : i32, i32
  }
  func.func @transform_3(%arg0: i32) -> (i32, i32) {
    %c0_i32 = arith.constant 0 : i32
    %c0_i32_0 = arith.constant 0 : i32
    return %arg0, %c0_i32 : i32, i32
  }
}

</mosaic_0001>

<bundles_post_ra>
// kernel: tile.18
= control target key start
LH: loop header
LB: loop body
LE: loop exit
PB: predicated region body
PF: predicated region fallthrough
CT: control target
= control target key end

     0   :  { %2 = vsyncpa [#allocation1], 0  ;;  %s48_s8 = smov [#allocation0]   ;;  %s65_s0 = inlined_call_operand.hbm [shape: f32[32], index: 0, kind: input, shape index: {}]   ;;  %s66_s1 = inlined_call_operand.vmem [shape: f32[4,32], index: 1, kind: output, shape index: {}]  }
   0x1   :  { %s8_s0 = sshll.u32 %s65_s0, 4  ;;  %s10_s9 = sshll.u32 %s48_s8, 4  ;;  %s9_s0 = int_to_ptr.hbm [resolvable:$true] %s8_s0  ;;  %s11_s9 = int_to_ptr.vmem [resolvable:$true] %s10_s9 }
   0x2   :  { %13 = dma.hbm_to_vmem [thread:$0]  %s9_s0, 16, %s11_s9, [#allocation1]  }
   0x3   :  { %46 = dma.done.wait [#allocation1], 16  }
   0x4   :  { %47 = vsyncadd [#allocation1], 4294967280  ;;  %v18_v0 = vld [vmem:[#allocation0] ss:$0 sm:$0xff] }
   0x5   :  { %19 = vst [vmem:[%s66_s1] sm:$0xf] %v18_v0 }
   0x6   :  { %20 = vsyncpa [#allocation1], 1 }

// kernel: tile.19
= control target key start
LH: loop header
LB: loop body
LE: loop exit
PB: predicated region body
PF: predicated region fallthrough
CT: control target
= control target key end

     0   :  { %s37_s8 = smov 32   ;;  %s38_s9 = smov 64   ;;  %vm7_vm0 = vcmask 261120   ;;  %vm13_vm1 = vcmask 1048320   ;;  %vm19_vm2 = vcmask 785920   ;;  %vm25_vm3 = vcmask 523520   ;;  %s55_s0 = inlined_call_operand.vmem [shape: f32[4,32], index: 0, kind: input, shape index: {}]   ;;  %s56_s1 = inlined_call_operand.vmem [shape: f32[1,128], index: 1, kind: output, shape index: {}]  }
   0x1   :  { %v4_v0 = vld [vmem:[%s55_s0] sm:$0xf]  ;;  %s36_s0 = smov 96  }
   0x2   :  { %5 = vst [vmem:[#allocation1] sm:$0xf] %v4_v0 }
   0x9   :  { %v10_v1 = vld [vmem:[#allocation1 + $0x3] sm:$0x1]   ;;  %v22_v2 = vld [vmem:[#allocation1 + $0x1] sm:$0x1]   ;;  %v16_v3 = vld [vmem:[#allocation1 + $0x2] sm:$0x1]  }
   0xa   :  { %11 = vrot.lane.b32.xlu0 %v10_v1, %s36_s0  ;;  %23 = vrot.lane.b32.xlu1 %v22_v2, %s37_s8  ;;  %v6_v4 = vld [vmem:[#allocation1] sm:$0x1]  }
   0xb   :  { %8 = vst.msk [vmem:[#allocation0] sm:$0x1] %vm7_vm0, %v6_v4  }
  0x12   :  { %17 = vrot.lane.b32.xlu0 %v16_v3, %s38_s9 }
  0x7c   :  { %v12_v5 = vpop.permute.xlu0 %11   ;;  %v24_v6 = vpop.permute.xlu1 %23  }
  0x7d   :  { %14 = vst.msk [vmem:[#allocation0] sm:$0x1] %vm13_vm1, %v12_v5  }
  0x84   :  { %v18_v7 = vpop.permute.xlu0 %17  }
  0x85   :  { %20 = vst.msk [vmem:[#allocation0] sm:$0x1] %vm19_vm2, %v18_v7  }
  0x86   :  { %26 = vst.msk [vmem:[#allocation0] sm:$0x1] %vm25_vm3, %v24_v6  }
  0x8d   :  { %v29_v8 = vld [vmem:[#allocation0] sm:$0x1] }
  0x8e   :  { %32 = vst [vmem:[%s56_s1] sm:$0x1] %v29_v8 }

// kernel: tile.28
= control target key start
LH: loop header
LB: loop body
LE: loop exit
PB: predicated region body
PF: predicated region fallthrough
CT: control target
= control target key end

     0   :  { %s22_s0 = inlined_call_operand.vmem [shape: f32[32], index: 0, kind: input, shape index: {}]   ;;  %s23_s1 = inlined_call_operand.vmem [shape: f32[4,32], index: 1, kind: output, shape index: {}]  }
   0x1   :  { %v4_v0 = vld [vmem:[%s22_s0] ss:$0 sm:$0xff] }
   0x2   :  { %5 = vst [vmem:[%s23_s1] sm:$0xf] %v4_v0 }

// kernel: up_conv_forward.3
= control target key start
LH: loop header
LB: loop body
LE: loop exit
PB: predicated region body
PF: predicated region fallthrough
CT: control target
= control target key end

     0   :  { %s1017_s0 = inlined_call_operand.vmem [shape: bf16[512,128], index: 0, kind: input, shape index: {}]   ;;  %s1018_s1 = inlined_call_operand.vmem [shape: f32[1,128], index: 1, kind: input, shape index: {}]   ;;  %s1019_s2 = inlined_call_operand.vmem [shape: f32[1,128], index: 2, kind: input, shape index: {}]   ;;  %s1020_s3 = inlined_call_operand.vmem [shape: f32[512,128], index: 3, kind: output, shape index: {}]  }
   0x1   :  { %v411_v0 = vld [vmem:[%s1017_s0] sm:$0xff]   ;;  %v538_v5 = vld [vmem:[%s1017_s0 + $0x8] sm:$0xff]   ;;  %v539_v8 = vld [vmem:[%s1017_s0 + $0x10] sm:$0xff]  }
   0x2   :  { %v597_v1 = vld [vmem:[%s1018_s1] ss:$0 sm:$0xff]  ;;  %v412_v2 = vunpack.c.l.bf16 %v411_v0  ;;  %v413_v4 = vunpack.c.h.bf16 %v411_v0  ;;  %v416_v6 = vunpack.c.l.bf16 %v538_v5  ;;  %v417_v7 = vunpack.c.h.bf16 %v538_v5  ;;  %v540_v9 = vld [vmem:[%s1017_s0 + $0x18] sm:$0xff]   ;;  %v542_v31 = vld [vmem:[%s1017_s0 + $0x28] sm:$0xff]  }
   0x3   :  { %v602_v3 = vld [vmem:[%s1019_s2] ss:$0 sm:$0xff]  ;;  %v420_v12 = vunpack.c.l.bf16 %v539_v8  ;;  %v421_v13 = vunpack.c.h.bf16 %v539_v8  ;;  %v424_v16 = vunpack.c.l.bf16 %v540_v9  ;;  %v425_v17 = vunpack.c.h.bf16 %v540_v9  ;;  %v543_v36 = vld [vmem:[%s1017_s0 + $0x30] sm:$0xff]   ;;  %v544_v41 = vld [vmem:[%s1017_s0 + $0x38] sm:$0xff]  }
   0x4   :  { %v146_v10 = vmul.f32 %v597_v1, %v412_v2  ;;  %v147_v11 = vmul.f32 %v597_v1, %v413_v4  ;;  %v148_v14 = vmul.f32 %v597_v1, %v416_v6  ;;  %v149_v15 = vmul.f32 %v597_v1, %v417_v7  ;;  %v541_v26 = vld [vmem:[%s1017_s0 + $0x20] sm:$0xff]   ;;  %v546_v5 = vld [vmem:[%s1017_s0 + $0x48] sm:$0xff]  }
   0x5   :  { %v150_v20 = vmul.f32 %v597_v1, %v420_v12  ;;  %v151_v21 = vmul.f32 %v597_v1, %v421_v13  ;;  %v152_v24 = vmul.f32 %v597_v1, %v424_v16  ;;  %v153_v25 = vmul.f32 %v597_v1, %v425_v17  ;;  %v545_v62 = vld [vmem:[%s1017_s0 + $0x40] sm:$0xff]  }
   0x6   :  { %v214_v18 = vadd.f32 %v602_v3, %v146_v10  ;;  %v215_v19 = vadd.f32 %v602_v3, %v147_v11  ;;  %v216_v22 = vadd.f32 %v602_v3, %v148_v14  ;;  %v217_v23 = vadd.f32 %v602_v3, %v149_v15  ;;  %v547_v10 = vld [vmem:[%s1017_s0 + $0x50] sm:$0xff]   ;;  %v548_v15 = vld [vmem:[%s1017_s0 + $0x58] sm:$0xff]  }
   0x7   :  { %v218_v29 = vadd.f32 %v602_v3, %v150_v20  ;;  %v219_v30 = vadd.f32 %v602_v3, %v151_v21  ;;  %v220_v34 = vadd.f32 %v602_v3, %v152_v24  ;;  %v221_v35 = vadd.f32 %v602_v3, %v153_v25 }
   0x8   :  { %v278_v27 = vmax.f32 %v214_v18, 0.0  ;;  %v279_v28 = vmax.f32 %v215_v19, 0.0  ;;  %v280_v32 = vmax.f32 %v216_v22, 0.0  ;;  %v281_v33 = vmax.f32 %v217_v23, 0.0 }
   0x9   :  { %v282_v37 = vmax.f32 %v218_v29, 0.0  ;;  %v283_v38 = vmax.f32 %v219_v30, 0.0  ;;  %v428_v39 = vunpack.c.l.bf16 %v541_v26  ;;  %v429_v40 = vunpack.c.h.bf16 %v541_v26 }
   0xa   :  { %342 = vst [vmem:[%s1020_s3] sm:$0xff] %v278_v27  ;;  %v284_v42 = vmax.f32 %v220_v34, 0.0  ;;  %v285_v43 = vmax.f32 %v221_v35, 0.0  ;;  %v432_v44 = vunpack.c.l.bf16 %v542_v31  ;;  %v433_v45 = vunpack.c.h.bf16 %v542_v31 }
   0xb   :  { %343 = vst [vmem:[%s1020_s3 + $0x8] sm:$0xff] %v279_v28  ;;  %v154_v46 = vmul.f32 %v597_v1, %v428_v39  ;;  %v155_v47 = vmul.f32 %v597_v1, %v429_v40  ;;  %v436_v48 = vunpack.c.l.bf16 %v543_v36  ;;  %v437_v49 = vunpack.c.h.bf16 %v543_v36  ;;  %v549_v36 = vld [vmem:[%s1017_s0 + $0x60] sm:$0xff]  }
   0xc   :  { %344 = vst [vmem:[%s1020_s3 + $0x10] sm:$0xff] %v280_v32  ;;  %v156_v50 = vmul.f32 %v597_v1, %v432_v44  ;;  %v157_v51 = vmul.f32 %v597_v1, %v433_v45  ;;  %v440_v52 = vunpack.c.l.bf16 %v544_v41  ;;  %v441_v53 = vunpack.c.h.bf16 %v544_v41  ;;  %v550_v41 = vld [vmem:[%s1017_s0 + $0x68] sm:$0xff]  }
   0xd   :  { %345 = vst [vmem:[%s1020_s3 + $0x18] sm:$0xff] %v281_v33  ;;  %v222_v54 = vadd.f32 %v602_v3, %v154_v46  ;;  %v223_v55 = vadd.f32 %v602_v3, %v155_v47  ;;  %v158_v56 = vmul.f32 %v597_v1, %v436_v48  ;;  %v159_v57 = vmul.f32 %v597_v1, %v437_v49  ;;  %v551_v46 = vld [vmem:[%s1017_s0 + $0x70] sm:$0xff]  }
   0xe   :  { %346 = vst [vmem:[%s1020_s3 + $0x20] sm:$0xff] %v282_v37  ;;  %v224_v58 = vadd.f32 %v602_v3, %v156_v50  ;;  %v225_v59 = vadd.f32 %v602_v3, %v157_v51  ;;  %v160_v60 = vmul.f32 %v597_v1, %v440_v52  ;;  %v161_v61 = vmul.f32 %v597_v1, %v441_v53  ;;  %v552_v51 = vld [vmem:[%s1017_s0 + $0x78] sm:$0xff]  }
   0xf   :  { %347 = vst [vmem:[%s1020_s3 + $0x28] sm:$0xff] %v283_v38  ;;  %v286_v63 = vmax.f32 %v222_v54, 0.0  ;;  %v287_v0 = vmax.f32 %v223_v55, 0.0  ;;  %v226_v2 = vadd.f32 %v602_v3, %v158_v56  ;;  %v227_v4 = vadd.f32 %v602_v3, %v159_v57 }
  0x10   :  { %348 = vst [vmem:[%s1020_s3 + $0x30] sm:$0xff] %v284_v42  ;;  %v288_v6 = vmax.f32 %v224_v58, 0.0  ;;  %v289_v7 = vmax.f32 %v225_v59, 0.0  ;;  %v228_v8 = vadd.f32 %v602_v3, %v160_v60  ;;  %v229_v9 = vadd.f32 %v602_v3, %v161_v61 }
  0x11   :  { %349 = vst [vmem:[%s1020_s3 + $0x38] sm:$0xff] %v285_v43  ;;  %v290_v11 = vmax.f32 %v226_v2, 0.0  ;;  %v291_v12 = vmax.f32 %v227_v4, 0.0  ;;  %v444_v13 = vunpack.c.l.bf16 %v545_v62  ;;  %v445_v14 = vunpack.c.h.bf16 %v545_v62 }
  0x12   :  { %350 = vst [vmem:[%s1020_s3 + $0x40] sm:$0xff] %v286_v63  ;;  %v292_v16 = vmax.f32 %v228_v8, 0.0  ;;  %v293_v17 = vmax.f32 %v229_v9, 0.0  ;;  %v448_v18 = vunpack.c.l.bf16 %v546_v5  ;;  %v449_v19 = vunpack.c.h.bf16 %v546_v5 }
  0x13   :  { %351 = vst [vmem:[%s1020_s3 + $0x48] sm:$0xff] %v287_v0  ;;  %v162_v20 = vmul.f32 %v597_v1, %v444_v13  ;;  %v163_v21 = vmul.f32 %v597_v1, %v445_v14  ;;  %v452_v22 = vunpack.c.l.bf16 %v547_v10  ;;  %v453_v23 = vunpack.c.h.bf16 %v547_v10  ;;  %v553_v10 = vld [vmem:[%s1017_s0 + $0x80] sm:$0xff]  }
  0x14   :  { %352 = vst [vmem:[%s1020_s3 + $0x50] sm:$0xff] %v288_v6  ;;  %v164_v24 = vmul.f32 %v597_v1, %v448_v18  ;;  %v165_v25 = vmul.f32 %v597_v1, %v449_v19  ;;  %v456_v26 = vunpack.c.l.bf16 %v548_v15  ;;  %v457_v27 = vunpack.c.h.bf16 %v548_v15  ;;  %v554_v15 = vld [vmem:[%s1017_s0 + $0x88] sm:$0xff]  }
  0x15   :  { %353 = vst [vmem:[%s1020_s3 + $0x58] sm:$0xff] %v289_v7  ;;  %v230_v28 = vadd.f32 %v602_v3, %v162_v20  ;;  %v231_v29 = vadd.f32 %v602_v3, %v163_v21  ;;  %v166_v30 = vmul.f32 %v597_v1, %v452_v22  ;;  %v167_v31 = vmul.f32 %v597_v1, %v453_v23  ;;  %v555_v20 = vld [vmem:[%s1017_s0 + $0x90] sm:$0xff]  }
  0x16   :  { %354 = vst [vmem:[%s1020_s3 + $0x60] sm:$0xff] %v290_v11  ;;  %v232_v32 = vadd.f32 %v602_v3, %v164_v24  ;;  %v233_v33 = vadd.f32 %v602_v3, %v165_v25  ;;  %v168_v34 = vmul.f32 %v597_v1, %v456_v26  ;;  %v169_v35 = vmul.f32 %v597_v1, %v457_v27  ;;  %v556_v25 = vld [vmem:[%s1017_s0 + $0x98] sm:$0xff]  }
  0x17   :  { %355 = vst [vmem:[%s1020_s3 + $0x68] sm:$0xff] %v291_v12  ;;  %v294_v37 = vmax.f32 %v230_v28, 0.0  ;;  %v295_v38 = vmax.f32 %v231_v29, 0.0  ;;  %v234_v39 = vadd.f32 %v602_v3, %v166_v30  ;;  %v235_v40 = vadd.f32 %v602_v3, %v167_v31 }
  0x18   :  { %356 = vst [vmem:[%s1020_s3 + $0x70] sm:$0xff] %v292_v16  ;;  %v296_v42 = vmax.f32 %v232_v32, 0.0  ;;  %v297_v43 = vmax.f32 %v233_v33, 0.0  ;;  %v236_v44 = vadd.f32 %v602_v3, %v168_v34  ;;  %v237_v45 = vadd.f32 %v602_v3, %v169_v35 }
  0x19   :  { %357 = vst [vmem:[%s1020_s3 + $0x78] sm:$0xff] %v293_v17  ;;  %v298_v47 = vmax.f32 %v234_v39, 0.0  ;;  %v299_v48 = vmax.f32 %v235_v40, 0.0  ;;  %v460_v49 = vunpack.c.l.bf16 %v549_v36  ;;  %v461_v50 = vunpack.c.h.bf16 %v549_v36 }
  0x1a   :  { %358 = vst [vmem:[%s1020_s3 + $0x80] sm:$0xff] %v294_v37  ;;  %v300_v52 = vmax.f32 %v236_v44, 0.0  ;;  %v301_v53 = vmax.f32 %v237_v45, 0.0  ;;  %v464_v54 = vunpack.c.l.bf16 %v550_v41  ;;  %v465_v55 = vunpack.c.h.bf16 %v550_v41 }
  0x1b   :  { %359 = vst [vmem:[%s1020_s3 + $0x88] sm:$0xff] %v295_v38  ;;  %v170_v56 = vmul.f32 %v597_v1, %v460_v49  ;;  %v171_v57 = vmul.f32 %v597_v1, %v461_v50  ;;  %v468_v58 = vunpack.c.l.bf16 %v551_v46  ;;  %v469_v59 = vunpack.c.h.bf16 %v551_v46  ;;  %v557_v46 = vld [vmem:[%s1017_s0 + $0xa0] sm:$0xff]  }
  0x1c   :  { %360 = vst [vmem:[%s1020_s3 + $0x90] sm:$0xff] %v296_v42  ;;  %v172_v60 = vmul.f32 %v597_v1, %v464_v54  ;;  %v173_v61 = vmul.f32 %v597_v1, %v465_v55  ;;  %v472_v62 = vunpack.c.l.bf16 %v552_v51  ;;  %v473_v63 = vunpack.c.h.bf16 %v552_v51  ;;  %v558_v51 = vld [vmem:[%s1017_s0 + $0xa8] sm:$0xff]  }
  0x1d   :  { %361 = vst [vmem:[%s1020_s3 + $0x98] sm:$0xff] %v297_v43  ;;  %v238_v0 = vadd.f32 %v602_v3, %v170_v56  ;;  %v239_v2 = vadd.f32 %v602_v3, %v171_v57  ;;  %v174_v4 = vmul.f32 %v597_v1, %v468_v58  ;;  %v175_v5 = vmul.f32 %v597_v1, %v469_v59  ;;  %v559_v56 = vld [vmem:[%s1017_s0 + $0xb0] sm:$0xff]  }
  0x1e   :  { %362 = vst [vmem:[%s1020_s3 + $0xa0] sm:$0xff] %v298_v47  ;;  %v240_v6 = vadd.f32 %v602_v3, %v172_v60  ;;  %v241_v7 = vadd.f32 %v602_v3, %v173_v61  ;;  %v176_v8 = vmul.f32 %v597_v1, %v472_v62  ;;  %v177_v9 = vmul.f32 %v597_v1, %v473_v63  ;;  %v560_v61 = vld [vmem:[%s1017_s0 + $0xb8] sm:$0xff]  }
  0x1f   :  { %363 = vst [vmem:[%s1020_s3 + $0xa8] sm:$0xff] %v299_v48  ;;  %v302_v11 = vmax.f32 %v238_v0, 0.0  ;;  %v303_v12 = vmax.f32 %v239_v2, 0.0  ;;  %v242_v13 = vadd.f32 %v602_v3, %v174_v4  ;;  %v243_v14 = vadd.f32 %v602_v3, %v175_v5 }
  0x20   :  { %364 = vst [vmem:[%s1020_s3 + $0xb0] sm:$0xff] %v300_v52  ;;  %v304_v16 = vmax.f32 %v240_v6, 0.0  ;;  %v305_v17 = vmax.f32 %v241_v7, 0.0  ;;  %v244_v18 = vadd.f32 %v602_v3, %v176_v8  ;;  %v245_v19 = vadd.f32 %v602_v3, %v177_v9 }
  0x21   :  { %365 = vst [vmem:[%s1020_s3 + $0xb8] sm:$0xff] %v301_v53  ;;  %v306_v21 = vmax.f32 %v242_v13, 0.0  ;;  %v307_v22 = vmax.f32 %v243_v14, 0.0  ;;  %v476_v23 = vunpack.c.l.bf16 %v553_v10  ;;  %v477_v24 = vunpack.c.h.bf16 %v553_v10 }
  0x22   :  { %366 = vst [vmem:[%s1020_s3 + $0xc0] sm:$0xff] %v302_v11  ;;  %v308_v26 = vmax.f32 %v244_v18, 0.0  ;;  %v309_v27 = vmax.f32 %v245_v19, 0.0  ;;  %v480_v28 = vunpack.c.l.bf16 %v554_v15  ;;  %v481_v29 = vunpack.c.h.bf16 %v554_v15 }
  0x23   :  { %367 = vst [vmem:[%s1020_s3 + $0xc8] sm:$0xff] %v303_v12  ;;  %v178_v30 = vmul.f32 %v597_v1, %v476_v23  ;;  %v179_v31 = vmul.f32 %v597_v1, %v477_v24  ;;  %v484_v32 = vunpack.c.l.bf16 %v555_v20  ;;  %v485_v33 = vunpack.c.h.bf16 %v555_v20  ;;  %v561_v20 = vld [vmem:[%s1017_s0 + $0xc0] sm:$0xff]  }
  0x24   :  { %368 = vst [vmem:[%s1020_s3 + $0xd0] sm:$0xff] %v304_v16  ;;  %v180_v34 = vmul.f32 %v597_v1, %v480_v28  ;;  %v181_v35 = vmul.f32 %v597_v1, %v481_v29  ;;  %v488_v36 = vunpack.c.l.bf16 %v556_v25  ;;  %v489_v37 = vunpack.c.h.bf16 %v556_v25  ;;  %v562_v25 = vld [vmem:[%s1017_s0 + $0xc8] sm:$0xff]  }
  0x25   :  { %369 = vst [vmem:[%s1020_s3 + $0xd8] sm:$0xff] %v305_v17  ;;  %v246_v38 = vadd.f32 %v602_v3, %v178_v30  ;;  %v247_v39 = vadd.f32 %v602_v3, %v179_v31  ;;  %v182_v40 = vmul.f32 %v597_v1, %v484_v32  ;;  %v183_v41 = vmul.f32 %v597_v1, %v485_v33  ;;  %v563_v30 = vld [vmem:[%s1017_s0 + $0xd0] sm:$0xff]  }
  0x26   :  { %370 = vst [vmem:[%s1020_s3 + $0xe0] sm:$0xff] %v306_v21  ;;  %v248_v42 = vadd.f32 %v602_v3, %v180_v34  ;;  %v249_v43 = vadd.f32 %v602_v3, %v181_v35  ;;  %v184_v44 = vmul.f32 %v597_v1, %v488_v36  ;;  %v185_v45 = vmul.f32 %v597_v1, %v489_v37  ;;  %v564_v35 = vld [vmem:[%s1017_s0 + $0xd8] sm:$0xff]  }
  0x27   :  { %371 = vst [vmem:[%s1020_s3 + $0xe8] sm:$0xff] %v307_v22  ;;  %v310_v47 = vmax.f32 %v246_v38, 0.0  ;;  %v311_v48 = vmax.f32 %v247_v39, 0.0  ;;  %v250_v49 = vadd.f32 %v602_v3, %v182_v40  ;;  %v251_v50 = vadd.f32 %v602_v3, %v183_v41 }
  0x28   :  { %372 = vst [vmem:[%s1020_s3 + $0xf0] sm:$0xff] %v308_v26  ;;  %v312_v52 = vmax.f32 %v248_v42, 0.0  ;;  %v313_v53 = vmax.f32 %v249_v43, 0.0  ;;  %v252_v54 = vadd.f32 %v602_v3, %v184_v44  ;;  %v253_v55 = vadd.f32 %v602_v3, %v185_v45 }
  0x29   :  { %373 = vst [vmem:[%s1020_s3 + $0xf8] sm:$0xff] %v309_v27  ;;  %v314_v57 = vmax.f32 %v250_v49, 0.0  ;;  %v315_v58 = vmax.f32 %v251_v50, 0.0  ;;  %v492_v59 = vunpack.c.l.bf16 %v557_v46  ;;  %v493_v60 = vunpack.c.h.bf16 %v557_v46 }
  0x2a   :  { %374 = vst [vmem:[%s1020_s3 + $0x100] sm:$0xff] %v310_v47  ;;  %v316_v62 = vmax.f32 %v252_v54, 0.0  ;;  %v317_v63 = vmax.f32 %v253_v55, 0.0  ;;  %v496_v0 = vunpack.c.l.bf16 %v558_v51  ;;  %v497_v2 = vunpack.c.h.bf16 %v558_v51 }
  0x2b   :  { %375 = vst [vmem:[%s1020_s3 + $0x108] sm:$0xff] %v311_v48  ;;  %v186_v4 = vmul.f32 %v597_v1, %v492_v59  ;;  %v187_v5 = vmul.f32 %v597_v1, %v493_v60  ;;  %v500_v6 = vunpack.c.l.bf16 %v559_v56  ;;  %v501_v7 = vunpack.c.h.bf16 %v559_v56  ;;  %v565_v56 = vld [vmem:[%s1017_s0 + $0xe0] sm:$0xff]  }
  0x2c   :  { %376 = vst [vmem:[%s1020_s3 + $0x110] sm:$0xff] %v312_v52  ;;  %v188_v8 = vmul.f32 %v597_v1, %v496_v0  ;;  %v189_v9 = vmul.f32 %v597_v1, %v497_v2  ;;  %v504_v10 = vunpack.c.l.bf16 %v560_v61  ;;  %v505_v11 = vunpack.c.h.bf16 %v560_v61  ;;  %v566_v61 = vld [vmem:[%s1017_s0 + $0xe8] sm:$0xff]  }
  0x2d   :  { %377 = vst [vmem:[%s1020_s3 + $0x118] sm:$0xff] %v313_v53  ;;  %v254_v12 = vadd.f32 %v602_v3, %v186_v4  ;;  %v255_v13 = vadd.f32 %v602_v3, %v187_v5  ;;  %v190_v14 = vmul.f32 %v597_v1, %v500_v6  ;;  %v191_v15 = vmul.f32 %v597_v1, %v501_v7  ;;  %v567_v4 = vld [vmem:[%s1017_s0 + $0xf0] sm:$0xff]  }
  0x2e   :  { %378 = vst [vmem:[%s1020_s3 + $0x120] sm:$0xff] %v314_v57  ;;  %v256_v16 = vadd.f32 %v602_v3, %v188_v8  ;;  %v257_v17 = vadd.f32 %v602_v3, %v189_v9  ;;  %v192_v18 = vmul.f32 %v597_v1, %v504_v10  ;;  %v193_v19 = vmul.f32 %v597_v1, %v505_v11  ;;  %v568_v9 = vld [vmem:[%s1017_s0 + $0xf8] sm:$0xff]  }
  0x2f   :  { %379 = vst [vmem:[%s1020_s3 + $0x128] sm:$0xff] %v315_v58  ;;  %v318_v21 = vmax.f32 %v254_v12, 0.0  ;;  %v319_v22 = vmax.f32 %v255_v13, 0.0  ;;  %v258_v23 = vadd.f32 %v602_v3, %v190_v14  ;;  %v259_v24 = vadd.f32 %v602_v3, %v191_v15 }
  0x30   :  { %380 = vst [vmem:[%s1020_s3 + $0x130] sm:$0xff] %v316_v62  ;;  %v320_v26 = vmax.f32 %v256_v16, 0.0  ;;  %v321_v27 = vmax.f32 %v257_v17, 0.0  ;;  %v260_v28 = vadd.f32 %v602_v3, %v192_v18  ;;  %v261_v29 = vadd.f32 %v602_v3, %v193_v19 }
  0x31   :  { %381 = vst [vmem:[%s1020_s3 + $0x138] sm:$0xff] %v317_v63  ;;  %v322_v31 = vmax.f32 %v258_v23, 0.0  ;;  %v323_v32 = vmax.f32 %v259_v24, 0.0  ;;  %v508_v33 = vunpack.c.l.bf16 %v561_v20  ;;  %v509_v34 = vunpack.c.h.bf16 %v561_v20 }
  0x32   :  { %382 = vst [vmem:[%s1020_s3 + $0x140] sm:$0xff] %v318_v21  ;;  %v324_v36 = vmax.f32 %v260_v28, 0.0  ;;  %v325_v37 = vmax.f32 %v261_v29, 0.0  ;;  %v512_v38 = vunpack.c.l.bf16 %v562_v25  ;;  %v513_v39 = vunpack.c.h.bf16 %v562_v25 }
  0x33   :  { %383 = vst [vmem:[%s1020_s3 + $0x148] sm:$0xff] %v319_v22  ;;  %v194_v40 = vmul.f32 %v597_v1, %v508_v33  ;;  %v195_v41 = vmul.f32 %v597_v1, %v509_v34  ;;  %v516_v42 = vunpack.c.l.bf16 %v563_v30  ;;  %v517_v43 = vunpack.c.h.bf16 %v563_v30 }
  0x34   :  { %384 = vst [vmem:[%s1020_s3 + $0x150] sm:$0xff] %v320_v26  ;;  %v196_v44 = vmul.f32 %v597_v1, %v512_v38  ;;  %v197_v45 = vmul.f32 %v597_v1, %v513_v39  ;;  %v520_v46 = vunpack.c.l.bf16 %v564_v35  ;;  %v521_v47 = vunpack.c.h.bf16 %v564_v35 }
  0x35   :  { %385 = vst [vmem:[%s1020_s3 + $0x158] sm:$0xff] %v321_v27  ;;  %v262_v48 = vadd.f32 %v602_v3, %v194_v40  ;;  %v263_v49 = vadd.f32 %v602_v3, %v195_v41  ;;  %v198_v50 = vmul.f32 %v597_v1, %v516_v42  ;;  %v199_v51 = vmul.f32 %v597_v1, %v517_v43 }
  0x36   :  { %386 = vst [vmem:[%s1020_s3 + $0x160] sm:$0xff] %v322_v31  ;;  %v264_v52 = vadd.f32 %v602_v3, %v196_v44  ;;  %v265_v53 = vadd.f32 %v602_v3, %v197_v45  ;;  %v200_v54 = vmul.f32 %v597_v1, %v520_v46  ;;  %v201_v55 = vmul.f32 %v597_v1, %v521_v47 }
  0x37   :  { %387 = vst [vmem:[%s1020_s3 + $0x168] sm:$0xff] %v323_v32  ;;  %v326_v57 = vmax.f32 %v262_v48, 0.0  ;;  %v327_v58 = vmax.f32 %v263_v49, 0.0  ;;  %v266_v59 = vadd.f32 %v602_v3, %v198_v50  ;;  %v267_v60 = vadd.f32 %v602_v3, %v199_v51 }
  0x38   :  { %388 = vst [vmem:[%s1020_s3 + $0x170] sm:$0xff] %v324_v36  ;;  %v328_v62 = vmax.f32 %v264_v52, 0.0  ;;  %v329_v63 = vmax.f32 %v265_v53, 0.0  ;;  %v268_v0 = vadd.f32 %v602_v3, %v200_v54  ;;  %v269_v2 = vadd.f32 %v602_v3, %v201_v55 }
  0x39   :  { %389 = vst [vmem:[%s1020_s3 + $0x178] sm:$0xff] %v325_v37  ;;  %v330_v5 = vmax.f32 %v266_v59, 0.0  ;;  %v331_v6 = vmax.f32 %v267_v60, 0.0  ;;  %v524_v7 = vunpack.c.l.bf16 %v565_v56  ;;  %v525_v8 = vunpack.c.h.bf16 %v565_v56 }
  0x3a   :  { %390 = vst [vmem:[%s1020_s3 + $0x180] sm:$0xff] %v326_v57  ;;  %v332_v10 = vmax.f32 %v268_v0, 0.0  ;;  %v333_v11 = vmax.f32 %v269_v2, 0.0  ;;  %v528_v12 = vunpack.c.l.bf16 %v566_v61  ;;  %v529_v13 = vunpack.c.h.bf16 %v566_v61 }
  0x3b   :  { %391 = vst [vmem:[%s1020_s3 + $0x188] sm:$0xff] %v327_v58  ;;  %v202_v14 = vmul.f32 %v597_v1, %v524_v7  ;;  %v203_v15 = vmul.f32 %v597_v1, %v525_v8  ;;  %v532_v16 = vunpack.c.l.bf16 %v567_v4  ;;  %v533_v17 = vunpack.c.h.bf16 %v567_v4 }
  0x3c   :  { %392 = vst [vmem:[%s1020_s3 + $0x190] sm:$0xff] %v328_v62  ;;  %v204_v18 = vmul.f32 %v597_v1, %v528_v12  ;;  %v205_v19 = vmul.f32 %v597_v1, %v529_v13  ;;  %v536_v20 = vunpack.c.l.bf16 %v568_v9  ;;  %v537_v21 = vunpack.c.h.bf16 %v568_v9 }
  0x3d   :  { %393 = vst [vmem:[%s1020_s3 + $0x198] sm:$0xff] %v329_v63  ;;  %v270_v22 = vadd.f32 %v602_v3, %v202_v14  ;;  %v271_v23 = vadd.f32 %v602_v3, %v203_v15  ;;  %v206_v24 = vmul.f32 %v597_v1, %v532_v16  ;;  %v207_v25 = vmul.f32 %v597_v1, %v533_v17 }
  0x3e   :  { %394 = vst [vmem:[%s1020_s3 + $0x1a0] sm:$0xff] %v330_v5  ;;  %v272_v26 = vadd.f32 %v602_v3, %v204_v18  ;;  %v273_v27 = vadd.f32 %v602_v3, %v205_v19  ;;  %v208_v28 = vmul.f32 %v597_v1, %v536_v20  ;;  %v209_v29 = vmul.f32 %v597_v1, %v537_v21 }
  0x3f   :  { %395 = vst [vmem:[%s1020_s3 + $0x1a8] sm:$0xff] %v331_v6  ;;  %v334_v30 = vmax.f32 %v270_v22, 0.0  ;;  %v335_v31 = vmax.f32 %v271_v23, 0.0  ;;  %v274_v32 = vadd.f32 %v602_v3, %v206_v24  ;;  %v275_v33 = vadd.f32 %v602_v3, %v207_v25 }
  0x40   :  { %396 = vst [vmem:[%s1020_s3 + $0x1b0] sm:$0xff] %v332_v10  ;;  %v336_v34 = vmax.f32 %v272_v26, 0.0  ;;  %v337_v35 = vmax.f32 %v273_v27, 0.0  ;;  %v276_v36 = vadd.f32 %v602_v3, %v208_v28  ;;  %v277_v1 = vadd.f32 %v602_v3, %v209_v29 }
  0x41   :  { %397 = vst [vmem:[%s1020_s3 + $0x1b8] sm:$0xff] %v333_v11  ;;  %v338_v37 = vmax.f32 %v274_v32, 0.0  ;;  %v339_v38 = vmax.f32 %v275_v33, 0.0 }
  0x42   :  { %398 = vst [vmem:[%s1020_s3 + $0x1c0] sm:$0xff] %v334_v30  ;;  %v340_v39 = vmax.f32 %v276_v36, 0.0  ;;  %v341_v3 = vmax.f32 %v277_v1, 0.0 }
  0x43   :  { %399 = vst [vmem:[%s1020_s3 + $0x1c8] sm:$0xff] %v335_v31 }
  0x44   :  { %400 = vst [vmem:[%s1020_s3 + $0x1d0] sm:$0xff] %v336_v34 }
  0x45   :  { %401 = vst [vmem:[%s1020_s3 + $0x1d8] sm:$0xff] %v337_v35 }
  0x46   :  { %402 = vst [vmem:[%s1020_s3 + $0x1e0] sm:$0xff] %v338_v37 }
  0x47   :  { %403 = vst [vmem:[%s1020_s3 + $0x1e8] sm:$0xff] %v339_v38 }
  0x48   :  { %404 = vst [vmem:[%s1020_s3 + $0x1f0] sm:$0xff] %v340_v39 }
  0x49   :  { %405 = vst [vmem:[%s1020_s3 + $0x1f8] sm:$0xff] %v341_v3 }

// kernel: up_conv_forward.2
= control target key start
LH: loop header
LB: loop body
LE: loop exit
PB: predicated region body
PF: predicated region fallthrough
CT: control target
= control target key end

     0   :  { %s3375_s18 = smov 0   ;;  %s3377_s19 = smov 0   ;;  %s4265_s0 = inlined_call_operand.vmem [shape: bf16[2,18,18,128], index: 0, kind: input, shape index: {}]   ;;  %s4266_s1 = inlined_call_operand.vmem [shape: bf16[1152,128], index: 1, kind: input, shape index: {}]   ;;  %s4267_s2 = inlined_call_operand.vmem [shape: f32[1,128], index: 2, kind: input, shape index: {}]   ;;  %s4268_s3 = inlined_call_operand.vmem [shape: bf16[2,16,16,128], index: 3, kind: output, shape index: {0}]   ;;  %s4269_s4 = inlined_call_operand.vmem [shape: f32[2,1,128], index: 4, kind: output, shape index: {1}]   ;;  %s4270_s5 = inlined_call_operand.vmem [shape: f32[2,1,128], index: 5, kind: output, shape index: {2}]  }
   0x1   :  { %s3379_s20 = smov 0  }
   0x2 LB: > { %s28_s21 = sadd.s32 1, %s3339_s19  ;;  %p2705_p0 = scmp.ge.s32.totalorder %s3343_s20, 1  ;;  %s3343_s20 = sphi %s3379_s20, %s16_s20   ;;  %s3339_s19 = sphi %s3377_s19, %s4321_s19   ;;  %s3335_s18 = sphi %s3375_s18, %s4320_s18  }
   0x3   : > { %p30_p1 = scmp.ge.s32.totalorder %s28_s21, 2  ;;  %p210_p2 = scmp.lt.s32.totalorder %s3343_s20, 3 }
   0x5   : > { %s4323_s21 = smov (%p30_p1, %s28_s21), 0  ;;  %p211_p3 = pnand %p2705_p0, %p210_p2 }
   0x7   : > { %214 = sbr.rel (%p211_p3) target bundleno = 767 (0x2ff), region = 32 }
   0xc   : > { %v3097_v0 = vld [vmem:[%s4266_s1 + $0x38] sm:$0xff]  ;;  %v3096_v1 = vld [vmem:[%s4266_s1 + $0x30] sm:$0xff]  ;;  %v3095_v2 = vld [vmem:[%s4266_s1 + $0x28] sm:$0xff]  ;;  %p251_p4 = scmp.lt.s32.totalorder %s3335_s18, 1  ;;  %vm479_vm0 = vsmask.f32 7424 }
   0xd   : > { %3257 = vmatpush.bf16.msra.mxu1 %v3097_v0  ;;  %3258 = vmatpush.bf16.msra.mxu2 %v3097_v0  ;;  %v3094_v3 = vld [vmem:[%s4266_s1 + $0x20] sm:$0xff]  ;;  %v3093_v4 = vld [vmem:[%s4266_s1 + $0x18] sm:$0xff]  ;;  %v3092_v5 = vld [vmem:[%s4266_s1 + $0x10] sm:$0xff]  ;;  %vm688_vm1 = vcmask 1046528  }
   0xe   : > { %3259 = vmatpush.bf16.msra.mxu3 %v3097_v0  ;;  %1381 = vmatpush.bf16.msra.mxu0 %v3097_v0  ;;  %s4325_s18 = smov (!%p251_p4, %s3335_s18), 1  ;;  %v3091_v6 = vld [vmem:[%s4266_s1 + $0x8] sm:$0xff]  ;;  %v3090_v7 = vld [vmem:[%s4266_s1] sm:$0xff]  ;;  %v3113_v8 = vld [vmem:[%s4266_s1 + $0xb8] sm:$0xff] }
   0xf   : > { %s3281_s11 = smul.u32 216, %s4325_s18  ;;  %v3121_v9 = vld [vmem:[%s4266_s1 + $0xf8] sm:$0xff]  ;;  %v3112_v16 = vld [vmem:[%s4266_s1 + $0xb0] sm:$0xff]  ;;  %v3111_v20 = vld [vmem:[%s4266_s1 + $0xa8] sm:$0xff]  ;;  %s3071_s6 = sshll.u32 %s4325_s18, 7 }
  0x10   : > { %v3105_v14 = vld [vmem:[%s4266_s1 + $0x78] sm:$0xff]  ;;  %v3120_v17 = vld [vmem:[%s4266_s1 + $0xf0] sm:$0xff]  ;;  %v3119_v21 = vld [vmem:[%s4266_s1 + $0xe8] sm:$0xff]  ;;  %s4145_s9 = scalar_lea.vmem %s4268_s3, %s3071_s6  ;;  %s275_s14 = scalar_lea.vmem %s4270_s5, %s4325_s18 }
  0x11   : > { %3260 = vmatpush.bf16.msra.mxu1 %v3096_v1  ;;  %3261 = vmatpush.bf16.msra.mxu2 %v3096_v1  ;;  %s3427_s16 = scalar_lea.vmem %s4265_s0, %s3281_s11  ;;  %v3129_v15 = vld [vmem:[%s4266_s1 + $0x138] sm:$0xff]  ;;  %v3104_v18 = vld [vmem:[%s4266_s1 + $0x70] sm:$0xff]  ;;  %v3103_v22 = vld [vmem:[%s4266_s1 + $0x68] sm:$0xff]  ;;  %s270_s11 = scalar_lea.vmem %s4269_s4, %s4325_s18 }
  0x12   : > { %3262 = vmatpush.bf16.msra.mxu3 %v3096_v1  ;;  %1382 = vmatpush.bf16.msra.mxu0 %v3096_v1  ;;  %v3436_v10 = vld [vmem:[%s3427_s16 + $0x30] sm:$0xff]  ;;  %v3439_v11 = vld [vmem:[%s3427_s16 + $0x60] sm:$0xff]  ;;  %v3127_v23 = vld [vmem:[%s4266_s1 + $0x128] sm:$0xff] }
  0x13   : > { %v3442_v12 = vld [vmem:[%s3427_s16 + $0x90] sm:$0xff]  ;;  %v3445_v13 = vld [vmem:[%s3427_s16] sm:$0xff]  ;;  %v3109_v28 = vld [vmem:[%s4266_s1 + $0x98] sm:$0xff] }
  0x14   : > { %v3128_v19 = vld [vmem:[%s4266_s1 + $0x130] sm:$0xff]  ;;  %v3110_v24 = vld [vmem:[%s4266_s1 + $0xa0] sm:$0xff]  ;;  %v3117_v29 = vld [vmem:[%s4266_s1 + $0xd8] sm:$0xff]  ;;  %v483_v1 = vshll.u32 %v3445_v13, 16 }
  0x15   : > { %3263 = vmatpush.bf16.msra.mxu1 %v3095_v2  ;;  %3264 = vmatpush.bf16.msra.mxu2 %v3095_v2  ;;  %v3118_v25 = vld [vmem:[%s4266_s1 + $0xe0] sm:$0xff]  ;;  %v3503_v31 = vld [vmem:[%s3427_s16 + $0x6c] sm:$0xff]  ;;  %v3101_v34 = vld [vmem:[%s4266_s1 + $0x58] sm:$0xff] }
  0x16   : > { %3265 = vmatpush.bf16.msra.mxu3 %v3095_v2  ;;  %1383 = vmatpush.bf16.msra.mxu0 %v3095_v2  ;;  %v3102_v26 = vld [vmem:[%s4266_s1 + $0x60] sm:$0xff]  ;;  %v3509_v33 = vld [vmem:[%s3427_s16 + $0xc] sm:$0xff]  ;;  %v3125_v35 = vld [vmem:[%s4266_s1 + $0x118] sm:$0xff] }
  0x17   : > { %v3126_v27 = vld [vmem:[%s4266_s1 + $0x120] sm:$0xff]  ;;  %v3108_v36 = vld [vmem:[%s4266_s1 + $0x90] sm:$0xff]  ;;  %v3107_v40 = vld [vmem:[%s4266_s1 + $0x88] sm:$0xff] }
  0x18   : > { %v3500_v30 = vld [vmem:[%s3427_s16 + $0x3c] sm:$0xff]  ;;  %v3116_v37 = vld [vmem:[%s4266_s1 + $0xd0] sm:$0xff]  ;;  %v3115_v41 = vld [vmem:[%s4266_s1 + $0xc8] sm:$0xff] }
  0x19   : > { %3266 = vmatpush.bf16.msra.mxu1 %v3094_v3  ;;  %3267 = vmatpush.bf16.msra.mxu2 %v3094_v3  ;;  %v3506_v32 = vld [vmem:[%s3427_s16 + $0x9c] sm:$0xff]  ;;  %v3100_v38 = vld [vmem:[%s4266_s1 + $0x50] sm:$0xff]  ;;  %v3099_v42 = vld [vmem:[%s4266_s1 + $0x48] sm:$0xff] }
  0x1a   : > { %3268 = vmatpush.bf16.msra.mxu3 %v3094_v3  ;;  %1384 = vmatpush.bf16.msra.mxu0 %v3094_v3  ;;  %v3124_v39 = vld [vmem:[%s4266_s1 + $0x110] sm:$0xff]  ;;  %v3123_v43 = vld [vmem:[%s4266_s1 + $0x108] sm:$0xff]  ;;  %v3106_v44 = vld [vmem:[%s4266_s1 + $0x80] sm:$0xff]  ;;  %v495_v3 = vshll.u32 %v3509_v33, 16 }
  0x1b   : > { %v3114_v45 = vld [vmem:[%s4266_s1 + $0xc0] sm:$0xff]  ;;  %v3558_v48 = vld [vmem:[%s3427_s16 + $0x48] sm:$0xff]  ;;  %v3561_v49 = vld [vmem:[%s3427_s16 + $0x78] sm:$0xff] }
  0x1c   : > { %v3098_v46 = vld [vmem:[%s4266_s1 + $0x40] sm:$0xff]  ;;  %v3564_v50 = vld [vmem:[%s3427_s16 + $0xa8] sm:$0xff]  ;;  %v3567_v51 = vld [vmem:[%s3427_s16 + $0x18] sm:$0xff] }
  0x1d   : > { %3269 = vmatpush.bf16.msra.mxu1 %v3093_v4  ;;  %3270 = vmatpush.bf16.msra.mxu2 %v3093_v4  ;;  %v3122_v47 = vld [vmem:[%s4266_s1 + $0x100] sm:$0xff]  ;;  %v3145_v52 = vld [vmem:[%s4266_s1 + $0x1b8] sm:$0xff]  ;;  %v283_v56 = vld [vmem:[%s3427_s16 + $0x8] sm:$0x1] }
  0x1e   : > { %3271 = vmatpush.bf16.msra.mxu3 %v3093_v4  ;;  %1385 = vmatpush.bf16.msra.mxu0 %v3093_v4  ;;  %v3153_v53 = vld [vmem:[%s4266_s1 + $0x1f8] sm:$0xff]  ;;  %v286_v57 = vld [vmem:[%s3427_s16 + $0x14] sm:$0x1]  ;;  %v3591_v59 = vld [vmem:[%s3427_s16 + $0x84] sm:$0xff]  ;;  %v447_v62 = vunpack.c.l.b16 %v283_v56  ;;  %v481_v4 = vshrl.u32 %v3445_v13, 16 }
  0x1f   : > { %v3137_v54 = vld [vmem:[%s4266_s1 + $0x178] sm:$0xff]  ;;  %v3597_v61 = vld [vmem:[%s3427_s16 + $0x24] sm:$0xff]  ;;  %v448_v63 = vunpack.c.l.b16 %v286_v57 }
  0x20   : > { %v3161_v55 = vld [vmem:[%s4266_s1 + $0x238] sm:$0xff]  ;;  %v463_v0 = vpack.c.b16 %v447_v62, %v447_v62 }
  0x21   : > { %3272 = vmatpush.bf16.msra.mxu1 %v3092_v5  ;;  %3273 = vmatpush.bf16.msra.mxu2 %v3092_v5  ;;  %v3588_v58 = vld [vmem:[%s3427_s16 + $0x54] sm:$0xff]  ;;  %v464_v2 = vpack.c.b16 %v448_v63, %v448_v63 }
  0x22   : > { %3274 = vmatpush.bf16.msra.mxu3 %v3092_v5  ;;  %1386 = vmatpush.bf16.msra.mxu0 %v3092_v5  ;;  %v3594_v60 = vld [vmem:[%s3427_s16 + $0xb4] sm:$0xff]  ;;  %v485_v5 = vrot.slane %v483_v1, 1  ;;  %v3151_v1 = vld [vmem:[%s4266_s1 + $0x1e8] sm:$0xff] }
  0x23   : > { %v295_v57 = vld [vmem:[%s3427_s16 + $0x38] sm:$0x1] }
  0x25   : > { %3275 = vmatpush.bf16.msra.mxu1 %v3091_v6  ;;  %3276 = vmatpush.bf16.msra.mxu2 %v3091_v6 }
  0x26   : > { %3277 = vmatpush.bf16.msra.mxu3 %v3091_v6  ;;  %1387 = vmatpush.bf16.msra.mxu0 %v3091_v6  ;;  %v488_v6 = vshll.u32 %v463_v0, 16 }
  0x29   : > { %3278 = vmatpush.bf16.msra.mxu1 %v3090_v7  ;;  %3279 = vmatpush.bf16.msra.mxu2 %v3090_v7 }
  0x2a   : > { %3280 = vmatpush.bf16.msra.mxu3 %v3090_v7  ;;  %1388 = vmatpush.bf16.msra.mxu0 %v3090_v7  ;;  %v493_v7 = vshrl.u32 %v3509_v33, 16 }
  0x2c   : > { %1409 = vmatmul.bf16.vlgmr.msra.gmra.mxu1 %v3436_v10  ;;  %1429 = vmatmul.bf16.vlgmr.msra.gmra.mxu2 %v3439_v11 }
  0x2d   : > { %1559 = vmatpush.bf16.msrb.mxu2 %v3113_v8  ;;  %1449 = vmatmul.bf16.vlgmr.msra.gmra.mxu3 %v3442_v12  ;;  %v497_v8 = vrot.slane %v495_v3, 1  ;;  %v531_v3 = vshll.u32 %v3436_v10, 16 }
  0x2e   : > { %1648 = vmatpush.bf16.msrb.mxu3 %v3121_v9  ;;  %1389 = vmatmul.bf16.vlgmr.msra.gmra.mxu0 %v3445_v13  ;;  %v500_v9 = vshll.u32 %v464_v2, 16 }
  0x2f   : > { %1470 = vmatpush.bf16.msrb.mxu1 %v3105_v14  ;;  %1737 = vmatpush.bf16.msrb.mxu0 %v3129_v15  ;;  %v486_v14 = vor.u32 %v485_v5, %v481_v4  ;;  %v490_v15 = vrot.slane %v488_v6, 1  ;;  %v3135_v4 = vld [vmem:[%s4266_s1 + $0x168] sm:$0xff]  ;;  %v529_v5 = vshrl.u32 %v3436_v10, 16  ;;  %v533_v6 = vrot.slane %v531_v3, 1 }
  0x31   : > { %1560 = vmatpush.bf16.msrb.mxu2 %v3112_v16  ;;  %v689_v16 = vrot.slane %v3445_v13, 1  ;;  %v3144_v13 = vld [vmem:[%s4266_s1 + $0x1b0] sm:$0xff] }
  0x32   : > { %1649 = vmatpush.bf16.msrb.mxu3 %v3120_v17  ;;  %v690_v17 = vrot.slane %v463_v0, 1  ;;  %v451_v0 = vunpack.c.l.b16 %v295_v57 }
  0x33   : > { %1471 = vmatpush.bf16.msrb.mxu1 %v3104_v18  ;;  %1738 = vmatpush.bf16.msrb.mxu0 %v3128_v19  ;;  %v498_v18 = vor.u32 %v497_v8, %v493_v7  ;;  %v502_v19 = vrot.slane %v500_v9, 1  ;;  %v3159_v8 = vld [vmem:[%s4266_s1 + $0x228] sm:$0xff]  ;;  %v698_v9 = vrot.slane %v3597_v61, 1 }
  0x35   : > { %1561 = vmatpush.bf16.msrb.mxu2 %v3111_v20  ;;  %v289_v20 = vld [vmem:[%s3427_s16 + $0x20] sm:$0x1] }
  0x36   : > { %1650 = vmatpush.bf16.msrb.mxu3 %v3119_v21  ;;  %v491_v21 = vsel %vm479_vm0, %v486_v14, %v490_v15  ;;  %v534_v15 = vor.u32 %v533_v6, %v529_v5 }
  0x37   : > { %1472 = vmatpush.bf16.msrb.mxu1 %v3103_v22  ;;  %1739 = vmatpush.bf16.msrb.mxu0 %v3127_v23  ;;  %v691_v22 = vsel %vm688_vm1, %v689_v16, %v690_v17  ;;  %v503_v23 = vsel %vm479_vm0, %v498_v18, %v502_v19  ;;  %v298_v17 = vld [vmem:[%s3427_s16 + $0x44] sm:$0x1] }
  0x39   : > { %1562 = vmatpush.bf16.msrb.mxu2 %v3110_v24  ;;  %v449_v24 = vunpack.c.l.b16 %v289_v20  ;;  %v452_v20 = vunpack.c.l.b16 %v298_v17  ;;  %v565_v17 = vshrl.u32 %v3588_v58, 16 }
  0x3a   : > { %1651 = vmatpush.bf16.msrb.mxu3 %v3118_v25  ;;  %v3152_v25 = vld [vmem:[%s4266_s1 + $0x1f0] sm:$0xff] }
  0x3b   : > { %1473 = vmatpush.bf16.msrb.mxu1 %v3102_v26  ;;  %1740 = vmatpush.bf16.msrb.mxu0 %v3126_v27  ;;  %v3136_v26 = vld [vmem:[%s4266_s1 + $0x170] sm:$0xff]  ;;  %v465_v27 = vpack.c.b16 %v449_v24, %v449_v24 }
  0x3c   : > { %1414 = vmatmul.bf16.gmra.mxu1 %v3500_v30  ;;  %1434 = vmatmul.bf16.gmra.mxu2 %v3503_v31 }
  0x3d   : > { %1563 = vmatpush.bf16.msrb.mxu2 %v3109_v28  ;;  %1454 = vmatmul.bf16.gmra.mxu3 %v3506_v32  ;;  %v507_v28 = vshll.u32 %v3567_v51, 16 }
  0x3e   : > { %1652 = vmatpush.bf16.msrb.mxu3 %v3117_v29  ;;  %1394 = vmatmul.bf16.gmra.mxu0 %v3509_v33  ;;  %v3160_v29 = vld [vmem:[%s4266_s1 + $0x230] sm:$0xff] }
  0x3f   : > { %1474 = vmatpush.bf16.msrb.mxu1 %v3101_v34  ;;  %1741 = vmatpush.bf16.msrb.mxu0 %v3125_v35  ;;  %v505_v34 = vshrl.u32 %v3567_v51, 16  ;;  %v509_v35 = vrot.slane %v507_v28, 1  ;;  %v301_v28 = vld [vmem:[%s3427_s16 + $0x50] sm:$0x1] }
  0x41   : > { %1564 = vmatpush.bf16.msrb.mxu2 %v3108_v36  ;;  %v512_v36 = vshll.u32 %v465_v27, 16 }
  0x42   : > { %1653 = vmatpush.bf16.msrb.mxu3 %v3116_v37  ;;  %v692_v37 = vrot.slane %v3509_v33, 1 }
  0x43   : > { %1475 = vmatpush.bf16.msrb.mxu1 %v3100_v38  ;;  %1742 = vmatpush.bf16.msrb.mxu0 %v3124_v39  ;;  %v693_v38 = vrot.slane %v464_v2, 1  ;;  %v510_v39 = vor.u32 %v509_v35, %v505_v34  ;;  %v467_v2 = vpack.c.b16 %v451_v0, %v451_v0 }
  0x45   : > { %1565 = vmatpush.bf16.msrb.mxu2 %v3107_v40  ;;  %v514_v40 = vrot.slane %v512_v36, 1  ;;  %v536_v7 = vshll.u32 %v467_v2, 16 }
  0x46   : > { %1654 = vmatpush.bf16.msrb.mxu3 %v3115_v41  ;;  %v292_v41 = vld [vmem:[%s3427_s16 + $0x2c] sm:$0x1] }
  0x47   : > { %1476 = vmatpush.bf16.msrb.mxu1 %v3099_v42  ;;  %1743 = vmatpush.bf16.msrb.mxu0 %v3123_v43  ;;  %v3630_v42 = vsel %vm688_vm1, %v692_v37, %v693_v38  ;;  %v3633_v43 = vsel %vm479_vm0, %v510_v39, %v514_v40  ;;  %v538_v16 = vrot.slane %v536_v7, 1  ;;  %v453_v37 = vunpack.c.l.b16 %v301_v28  ;;  %v3150_v38 = vld [vmem:[%s4266_s1 + $0x1e0] sm:$0xff] }
  0x48   : > { %v555_v40 = vshll.u32 %v3558_v48, 16 }
  0x49   : > { %1566 = vmatpush.bf16.msrb.mxu2 %v3106_v44  ;;  %v450_v44 = vunpack.c.l.b16 %v292_v41  ;;  %v3672_v19 = vsel %vm479_vm0, %v534_v15, %v538_v16  ;;  %v469_v39 = vpack.c.b16 %v453_v37, %v453_v37 }
  0x4a   : > { %1655 = vmatpush.bf16.msrb.mxu3 %v3114_v45  ;;  %v519_v45 = vshll.u32 %v3597_v61, 16 }
  0x4b   : > { %1477 = vmatpush.bf16.msrb.mxu1 %v3098_v46  ;;  %1744 = vmatpush.bf16.msrb.mxu0 %v3122_v47  ;;  %v517_v46 = vshrl.u32 %v3597_v61, 16 }
  0x4c   : > { %1419 = vmatmul.bf16.gmra.mxu1 %v3558_v48  ;;  %1439 = vmatmul.bf16.gmra.mxu2 %v3561_v49  ;;  %v521_v47 = vrot.slane %v519_v45, 1 }
  0x4d   : > { %1459 = vmatmul.bf16.gmra.mxu3 %v3564_v50  ;;  %1915 = vmatpush.bf16.msra.mxu2 %v3145_v52 }
  0x4e   : > { %1399 = vmatmul.bf16.gmra.mxu0 %v3567_v51  ;;  %2004 = vmatpush.bf16.msra.mxu3 %v3153_v53  ;;  %v695_v53 = vrot.slane %v3567_v51, 1 }
  0x4f   : > { %1826 = vmatpush.bf16.msra.mxu1 %v3137_v54  ;;  %2093 = vmatpush.bf16.msra.mxu0 %v3161_v55  ;;  %v696_v54 = vrot.slane %v465_v27, 1  ;;  %v522_v55 = vor.u32 %v521_v47, %v517_v46  ;;  %v553_v47 = vshrl.u32 %v3558_v48, 16 }
  0x51   : > { %1916 = vmatpush.bf16.msra.mxu2 %v3144_v13  ;;  %v3643_v62 = vsel %vm688_vm1, %v695_v53, %v696_v54  ;;  %v701_v13 = vrot.slane %v3436_v10, 1  ;;  %v560_v53 = vshll.u32 %v469_v39, 16  ;;  %v3158_v54 = vld [vmem:[%s4266_s1 + $0x220] sm:$0xff] }
  0x52   : > { %2005 = vmatpush.bf16.msra.mxu3 %v3152_v25  ;;  %v702_v25 = vrot.slane %v467_v2, 1 }
  0x53   : > { %1827 = vmatpush.bf16.msra.mxu1 %v3136_v26  ;;  %2094 = vmatpush.bf16.msra.mxu0 %v3160_v29  ;;  %v562_v0 = vrot.slane %v560_v53, 1 }
  0x54   : > { %v3685_v34 = vsel %vm688_vm1, %v701_v13, %v702_v25  ;;  %v307_v25 = vld [vmem:[%s3427_s16 + $0x68] sm:$0x1] }
  0x56   : > { %2006 = vmatpush.bf16.msra.mxu3 %v3151_v1  ;;  %v304_v1 = vld [vmem:[%s3427_s16 + $0x5c] sm:$0x1] }
  0x57   : > { %1828 = vmatpush.bf16.msra.mxu1 %v3135_v4  ;;  %2095 = vmatpush.bf16.msra.mxu0 %v3159_v8  ;;  %v454_v7 = vunpack.c.l.b16 %v304_v1  ;;  %v567_v8 = vshll.u32 %v3588_v58, 16  ;;  %v3157_v1 = vld [vmem:[%s4266_s1 + $0x218] sm:$0xff] }
  0x5a   : > { %2007 = vmatpush.bf16.msra.mxu3 %v3150_v38  ;;  %v455_v38 = vunpack.c.l.b16 %v307_v25 }
  0x5b   : > { %2096 = vmatpush.bf16.msra.mxu0 %v3158_v54 }
  0x5c   : > { %1424 = vmatmul.bf16.gmra.mxu1 %v3588_v58  ;;  %1444 = vmatmul.bf16.gmra.mxu2 %v3591_v59 }
  0x5d   : > { %1464 = vmatmul.bf16.gmra.mxu3 %v3594_v60 }
  0x5e   : > { %1404 = vmatmul.bf16.gmra.mxu0 %v3597_v61 }
  0x5f   : > { %2097 = vmatpush.bf16.msra.mxu0 %v3157_v1 }
  0x6c   : > { %1478 = vmatmul.bf16.vlgmr.msrb.gmra.mxu1 %v491_v21  ;;  %1567 = vmatmul.bf16.vlgmr.msrb.gmra.mxu2 %v691_v22  ;;  %v543_v21 = vshll.u32 %v3500_v30, 16  ;;  %v541_v22 = vshrl.u32 %v3500_v30, 16 }
  0x6d   : > { %1656 = vmatmul.bf16.vlgmr.msrb.gmra.mxu3 %v3509_v33  ;;  %v466_v33 = vpack.c.b16 %v450_v44, %v450_v44 }
  0x6e   : > { %1745 = vmatmul.bf16.vlgmr.msrb.gmra.mxu0 %v503_v23 }
  0x6f   : > { %v524_v52 = vshll.u32 %v466_v33, 16  ;;  %v699_v14 = vrot.slane %v466_v33, 1  ;;  %v3134_v33 = vld [vmem:[%s4266_s1 + $0x160] sm:$0xff] }
  0x70   : > { %1829 = vmatpush.bf16.msra.mxu1 %v3134_v33  ;;  %v579_v33 = vshll.u32 %v3439_v11, 16 }
  0x71   : > { %v526_v56 = vrot.slane %v524_v52, 1  ;;  %v3669_v18 = vsel %vm688_vm1, %v698_v9, %v699_v14  ;;  %v557_v52 = vrot.slane %v555_v40, 1  ;;  %v471_v40 = vpack.c.b16 %v455_v38, %v455_v38 }
  0x73   : > { %v3646_v63 = vsel %vm479_vm0, %v522_v55, %v526_v56  ;;  %v704_v55 = vrot.slane %v3500_v30, 1  ;;  %v558_v57 = vor.u32 %v557_v52, %v553_v47 }
  0x75   : > { %v3732_v6 = vsel %vm479_vm0, %v558_v57, %v562_v0  ;;  %v584_v57 = vshll.u32 %v471_v40, 16  ;;  %v3133_v0 = vld [vmem:[%s4266_s1 + $0x158] sm:$0xff] }
  0x76   : > { %1830 = vmatpush.bf16.msra.mxu1 %v3133_v0 }
  0x7c   : > { %1483 = vmatmul.bf16.gmra.mxu1 %v503_v23  ;;  %1572 = vmatmul.bf16.gmra.mxu2 %v3630_v42  ;;  %v545_v23 = vrot.slane %v543_v21, 1  ;;  %v707_v21 = vrot.slane %v3558_v48, 1 }
  0x7d   : > { %1661 = vmatmul.bf16.gmra.mxu3 %v3567_v51  ;;  %v3143_v51 = vld [vmem:[%s4266_s1 + $0x1a8] sm:$0xff] }
  0x7e   : > { %1750 = vmatmul.bf16.gmra.mxu0 %v3633_v43  ;;  %1917 = vmatpush.bf16.msra.mxu2 %v3143_v51  ;;  %v546_v26 = vor.u32 %v545_v23, %v541_v22  ;;  %v708_v22 = vrot.slane %v469_v39, 1  ;;  %v3149_v39 = vld [vmem:[%s4266_s1 + $0x1d8] sm:$0xff] }
  0x7f   : > { %2008 = vmatpush.bf16.msra.mxu3 %v3149_v39 }
  0x80   : > { %v3757_v28 = vsel %vm688_vm1, %v707_v21, %v708_v22  ;;  %v310_v21 = vld [vmem:[%s3427_s16 + $0x74] sm:$0x1] }
  0x81   : > { %4284 = vst [vmem:[#allocation6_spill] sm:$0xff] %v3757_v28 }
  0x8c   : > { %1488 = vmatmul.bf16.gmra.mxu1 %v3633_v43  ;;  %1577 = vmatmul.bf16.gmra.mxu2 %v3643_v62 }
  0x8d   : > { %1666 = vmatmul.bf16.gmra.mxu3 %v3597_v61  ;;  %v468_v61 = vpack.c.b16 %v452_v20, %v452_v20  ;;  %v569_v20 = vrot.slane %v567_v8, 1 }
  0x8e   : > { %1755 = vmatmul.bf16.gmra.mxu0 %v3646_v63 }
  0x8f   : > { %v548_v24 = vshll.u32 %v468_v61, 16  ;;  %v705_v56 = vrot.slane %v468_v61, 1  ;;  %v570_v23 = vor.u32 %v569_v20, %v565_v17  ;;  %v586_v20 = vrot.slane %v584_v57, 1 }
  0x90   : > { %v589_v57 = vshrl.u32 %v3503_v31, 16 }
  0x91   : > { %v550_v27 = vrot.slane %v548_v24, 1  ;;  %v3727_v4 = vsel %vm688_vm1, %v704_v55, %v705_v56  ;;  %v577_v55 = vshrl.u32 %v3439_v11, 16  ;;  %v581_v56 = vrot.slane %v579_v33, 1 }
  0x93   : > { %v3690_v36 = vsel %vm479_vm0, %v546_v26, %v550_v27  ;;  %v582_v17 = vor.u32 %v581_v56, %v577_v55 }
  0x95   : > { %v3804_v38 = vsel %vm479_vm0, %v582_v17, %v586_v20 }
  0x96   : > { %4289 = vst [vmem:[#allocation11_spill] sm:$0xff] %v3804_v38 }
  0x9c   : > { %1493 = vmatmul.bf16.gmra.mxu1 %v3646_v63  ;;  %1582 = vmatmul.bf16.gmra.mxu2 %v3669_v18 }
  0x9d   : > { %1671 = vmatmul.bf16.gmra.mxu3 %v3436_v10  ;;  %v3142_v10 = vld [vmem:[%s4266_s1 + $0x1a0] sm:$0xff] }
  0x9e   : > { %1760 = vmatmul.bf16.gmra.mxu0 %v3672_v19  ;;  %1918 = vmatpush.bf16.msra.mxu2 %v3142_v10 }
  0xa9   : > { %v3682_v29 = vpop.f32.mrf.mxu1 }
  0xab   : > { %v3687_v35 = vpop.f32.mrf.mxu0 }
  0xac   : > { %1498 = vmatmul.bf16.gmra.mxu1 %v3672_v19  ;;  %1587 = vmatmul.bf16.gmra.mxu2 %v3685_v34 }
  0xad   : > { %1676 = vmatmul.bf16.gmra.mxu3 %v3500_v30  ;;  %v470_v30 = vpack.c.b16 %v454_v7, %v454_v7  ;;  %v710_v7 = vrot.slane %v3588_v58, 1 }
  0xae   : > { %1765 = vmatmul.bf16.gmra.mxu0 %v3690_v36 }
  0xaf   : > { %v3703_v41 = vpop.f32.mrf.mxu2  ;;  %v572_v61 = vshll.u32 %v470_v30, 16  ;;  %v711_v8 = vrot.slane %v470_v30, 1  ;;  %v591_v30 = vshll.u32 %v3503_v31, 16 }
  0xb0   : > { %v3705_v44 = vpop.f32.mrf.mxu3 }
  0xb1   : > { %4280 = vst [vmem:[#allocation2_spill] sm:$0xff] %v3705_v44  ;;  %v3710_v45 = vpop.f32.mrf.mxu1  ;;  %v574_v24 = vrot.slane %v572_v61, 1  ;;  %v593_v0 = vrot.slane %v591_v30, 1 }
  0xb3   : > { %v3712_v46 = vpop.f32.mrf.mxu0  ;;  %v3762_v10 = vsel %vm479_vm0, %v570_v23, %v574_v24  ;;  %v3799_v24 = vsel %vm688_vm1, %v710_v7, %v711_v8  ;;  %v713_v7 = vrot.slane %v3439_v11, 1  ;;  %v714_v8 = vrot.slane %v471_v40, 1 }
  0xb4   : > { %4285 = vst [vmem:[#allocation7_spill] sm:$0xff] %v3762_v10  ;;  %v594_v17 = vor.u32 %v593_v0, %v589_v57 }
  0xb5   : > { %4288 = vst [vmem:[#allocation10_spill] sm:$0xff] %v3799_v24 }
  0xb7   : > { %v3719_v51 = vpop.f32.mrf.mxu2 }
  0xb8   : > { %v3722_v2 = vpop.f32.mrf.mxu3 }
  0xb9   : > { %4281 = vst [vmem:[#allocation3_spill] sm:$0xff] %v3722_v2  ;;  %v3724_v3 = vpop.f32.mrf.mxu1 }
  0xbb   : > { %v3729_v5 = vpop.f32.mrf.mxu0 }
  0xbc   : > { %1503 = vmatmul.bf16.gmra.mxu1 %v3690_v36  ;;  %1592 = vmatmul.bf16.gmra.mxu2 %v3727_v4 }
  0xbd   : > { %1681 = vmatmul.bf16.gmra.mxu3 %v3558_v48  ;;  %v3141_v48 = vld [vmem:[%s4266_s1 + $0x198] sm:$0xff] }
  0xbe   : > { %1770 = vmatmul.bf16.gmra.mxu0 %v3732_v6  ;;  %1919 = vmatpush.bf16.msra.mxu2 %v3141_v48  ;;  %v456_v48 = vunpack.c.l.b16 %v310_v21 }
  0xbf   : > { %v3739_v9 = vpop.f32.mrf.mxu2 }
  0xc0   : > { %v3741_v14 = vpop.f32.mrf.mxu3 }
  0xc1   : > { %4282 = vst [vmem:[#allocation4_spill] sm:$0xff] %v3741_v14  ;;  %v3743_v15 = vpop.f32.mrf.mxu1 }
  0xc3   : > { %v3745_v16 = vpop.f32.mrf.mxu0 }
  0xc7   : > { %v3749_v13 = vpop.f32.mrf.mxu2 }
  0xc8   : > { %v3752_v26 = vpop.f32.mrf.mxu3 }
  0xc9   : > { %4283 = vst [vmem:[#allocation5_spill] sm:$0xff] %v3752_v26  ;;  %v3754_v27 = vpop.f32.mrf.mxu1 }
  0xcb   : > { %v3759_v37 = vpop.f32.mrf.mxu0 }
  0xcc   : > { %1508 = vmatmul.bf16.gmra.mxu1 %v3732_v6  ;;  %1597 = vmatmul.bf16.gmra.mxu2 %v3757_v28 }
  0xcd   : > { %1686 = vmatmul.bf16.gmra.mxu3 %v3588_v58  ;;  %v472_v58 = vpack.c.b16 %v456_v48, %v456_v48  ;;  %v313_v48 = vld [vmem:[%s3427_s16 + $0x80] sm:$0x1] }
  0xce   : > { %1775 = vmatmul.bf16.gmra.mxu0 %v3762_v10 }
  0xcf   : > { %v3775_v47 = vpop.f32.mrf.mxu2  ;;  %v596_v1 = vshll.u32 %v472_v58, 16 }
  0xd0   : > { %v3777_v52 = vpop.f32.mrf.mxu3 }
  0xd1   : > { %4286 = vst [vmem:[#allocation8_spill] sm:$0xff] %v3777_v52  ;;  %v3779_v53 = vpop.f32.mrf.mxu1  ;;  %v598_v20 = vrot.slane %v596_v1, 1 }
  0xd3   : > { %v3781_v54 = vpop.f32.mrf.mxu0  ;;  %v3831_v30 = vsel %vm479_vm0, %v594_v17, %v598_v20 }
  0xd7   : > { %v3791_v61 = vpop.f32.mrf.mxu2 }
  0xd8   : > { %v3794_v22 = vpop.f32.mrf.mxu3 }
  0xd9   : > { %4287 = vst [vmem:[#allocation9_spill] sm:$0xff] %v3794_v22  ;;  %v3796_v23 = vpop.f32.mrf.mxu1 }
  0xdb   : > { %v3801_v25 = vpop.f32.mrf.mxu0 }
  0xdc   : > { %1513 = vmatmul.bf16.gmra.mxu1 %v3762_v10  ;;  %1602 = vmatmul.bf16.gmra.mxu2 %v3799_v24  ;;  %v457_v24 = vunpack.c.l.b16 %v313_v48 }
  0xdd   : > { %1691 = vmatmul.bf16.gmra.mxu3 %v3439_v11  ;;  %v3140_v11 = vld [vmem:[%s4266_s1 + $0x190] sm:$0xff] }
  0xde   : > { %1780 = vmatmul.bf16.gmra.mxu0 %v3804_v38  ;;  %v3843_v40 = vpack.c.b16 %v457_v24, %v457_v24  ;;  %1920 = vmatpush.bf16.msra.mxu2 %v3140_v11  ;;  %v3132_v24 = vld [vmem:[%s4266_s1 + $0x150] sm:$0xff] }
  0xdf   : > { %v3811_v39 = vpop.f32.mrf.mxu2  ;;  %1831 = vmatpush.bf16.msra.mxu1 %v3132_v24 }
  0xe0   : > { %v3813_v33 = vpop.f32.mrf.mxu3 }
  0xe1   : > { %4290 = vst [vmem:[#allocation12_spill] sm:$0xff] %v3813_v33  ;;  %v3815_v55 = vpop.f32.mrf.mxu1  ;;  %v3827_v33 = vsel %vm688_vm1, %v713_v7, %v714_v8  ;;  %v601_v8 = vshrl.u32 %v3561_v49, 16 }
  0xe2   : > { %4292 = vst [vmem:[#allocation14_spill] sm:$0xff] %v3827_v33 }
  0xe3   : > { %v3817_v56 = vpop.f32.mrf.mxu0 }
  0xe7   : > { %v3821_v21 = vpop.f32.mrf.mxu2 }
  0xe8   : > { %v3824_v22 = vpop.f32.mrf.mxu3 }
  0xe9   : > { %4291 = vst [vmem:[#allocation13_spill] sm:$0xff] %v3824_v22  ;;  %v1479_v52 = vpop.f32.mrf.mxu1 }
  0xea   : > { %v1480_v26 = vadd.f32 %v1479_v52, %v3687_v35  ;;  %v3148_v35 = vld [vmem:[%s4266_s1 + $0x1d0] sm:$0xff]  ;;  %v603_v52 = vshll.u32 %v3561_v49, 16 }
  0xeb   : > { %v1746_v14 = vpop.f32.mrf.mxu0  ;;  %2009 = vmatpush.bf16.msra.mxu3 %v3148_v35  ;;  %v716_v35 = vrot.slane %v3503_v31, 1 }
  0xec   : > { %1518 = vmatmul.bf16.gmra.mxu1 %v3804_v38  ;;  %1607 = vmatmul.bf16.gmra.mxu2 %v3827_v33  ;;  %v605_v22 = vrot.slane %v603_v52, 1  ;;  %v608_v33 = vshll.u32 %v3843_v40, 16 }
  0xed   : > { %1696 = vmatmul.bf16.gmra.mxu3 %v3503_v31 }
  0xee   : > { %1785 = vmatmul.bf16.gmra.mxu0 %v3831_v30 }
  0xef   : > { %v1568_v57 = vpop.f32.mrf.mxu2 }
  0xf0   : > { %v1569_v0 = vadd.f32 %v1568_v57, %v1480_v26  ;;  %v1657_v1 = vpop.f32.mrf.mxu3  ;;  %v3156_v26 = vld [vmem:[%s4266_s1 + $0x210] sm:$0xff]  ;;  %v717_v57 = vrot.slane %v472_v58, 1 }
  0xf1   : > { %v1481_v7 = vpop.f32.mrf.mxu1  ;;  %2098 = vmatpush.bf16.msra.mxu0 %v3156_v26 }
  0xf2   : > { %v1658_v17 = vadd.f32 %v1657_v1, %v1569_v0  ;;  %v1482_v20 = vadd.f32 %v1481_v7, %v3712_v46  ;;  %v606_v46 = vor.u32 %v605_v22, %v601_v8  ;;  %v610_v0 = vrot.slane %v608_v33, 1  ;;  %v316_v1 = vld [vmem:[%s3427_s16 + $0x8c] sm:$0x1] }
  0xf3   : > { %v1748_v48 = vpop.f32.mrf.mxu0  ;;  %v3860_v2 = vsel %vm688_vm1, %v716_v35, %v717_v57  ;;  %v613_v8 = vshrl.u32 %v3591_v59, 16 }
  0xf4   : > { %v3855_v11 = vadd.f32 %v1746_v14, %v1658_v17  ;;  %v3864_v14 = vsel %vm479_vm0, %v606_v46, %v610_v0  ;;  %v458_v17 = vunpack.c.l.b16 %v316_v1  ;;  %v719_v46 = vrot.slane %v3561_v49, 1 }
  0xf5   : > { %v720_v0 = vrot.slane %v3843_v40, 1 }
  0xf6   : > { %v3872_v22 = vpack.c.b16 %v458_v17, %v458_v17 }
  0xf7   : > { %v1570_v52 = vpop.f32.mrf.mxu2 }
  0xf8   : > { %v1571_v7 = vadd.f32 %v1570_v52, %v1482_v20  ;;  %v1659_v38 = vpop.f32.mrf.mxu3  ;;  %v620_v35 = vshll.u32 %v3872_v22, 16 }
  0xf9   : > { %v1484_v10 = vpop.f32.mrf.mxu1 }
  0xfa   : > { %v1660_v44 = vadd.f32 %v1659_v38, %v1571_v7  ;;  %v1485_v28 = vadd.f32 %v1484_v10, %v3729_v5  ;;  %v615_v38 = vshll.u32 %v3591_v59, 16  ;;  %v622_v1 = vrot.slane %v620_v35, 1  ;;  %v319_v7 = vld [vmem:[%s3427_s16 + $0x98] sm:$0x1] }
  0xfb   : > { %v1751_v24 = vpop.f32.mrf.mxu0  ;;  %v625_v35 = vshrl.u32 %v3442_v12, 16 }
  0xfc   : > { %1523 = vmatmul.bf16.gmra.mxu1 %v3831_v30  ;;  %1612 = vmatmul.bf16.gmra.mxu2 %v3860_v2  ;;  %v3868_v31 = vadd.f32 %v1748_v48, %v1660_v44  ;;  %v617_v48 = vrot.slane %v615_v38, 1 }
  0xfd   : > { %1701 = vmatmul.bf16.gmra.mxu3 %v3561_v49  ;;  %v459_v49 = vunpack.c.l.b16 %v319_v7  ;;  %v3131_v7 = vld [vmem:[%s4266_s1 + $0x148] sm:$0xff] }
  0xfe   : > { %4293 = vst [vmem:[#allocation15_spill] sm:$0xff] %v3868_v31  ;;  %1790 = vmatmul.bf16.gmra.mxu0 %v3864_v14  ;;  %v618_v52 = vor.u32 %v617_v48, %v613_v8  ;;  %v627_v8 = vshll.u32 %v3442_v12, 16  ;;  %1832 = vmatpush.bf16.msra.mxu1 %v3131_v7 }
  0xff   : > { %v1573_v5 = vpop.f32.mrf.mxu2 }
 0x100   : > { %v1574_v10 = vadd.f32 %v1573_v5, %v1485_v28  ;;  %v1662_v58 = vpop.f32.mrf.mxu3 }
 0x101   : > { %v1486_v33 = vpop.f32.mrf.mxu1 }
 0x102   : > { %v1663_v20 = vadd.f32 %v1662_v58, %v1574_v10  ;;  %v1487_v26 = vadd.f32 %v1486_v33, %v3745_v16  ;;  %v3884_v10 = vsel %vm688_vm1, %v719_v46, %v720_v0  ;;  %v3139_v33 = vld [vmem:[%s4266_s1 + $0x188] sm:$0xff] }
 0x103   : > { %v1753_v44 = vpop.f32.mrf.mxu0  ;;  %1921 = vmatpush.bf16.msra.mxu2 %v3139_v33 }
 0x104   : > { %v3878_v57 = vadd.f32 %v1751_v24, %v1663_v20  ;;  %v3888_v24 = vsel %vm479_vm0, %v618_v52, %v622_v1  ;;  %v629_v1 = vrot.slane %v627_v8, 1 }
 0x107   : > { %v1575_v28 = vpop.f32.mrf.mxu2 }
 0x108   : > { %v1576_v17 = vadd.f32 %v1575_v28, %v1487_v26  ;;  %v1664_v5 = vpop.f32.mrf.mxu3 }
 0x109   : > { %v1489_v31 = vpop.f32.mrf.mxu1 }
 0x10a   : > { %v1665_v16 = vadd.f32 %v1664_v5, %v1576_v17  ;;  %v1490_v38 = vadd.f32 %v1489_v31, %v3759_v37  ;;  %v3147_v37 = vld [vmem:[%s4266_s1 + $0x1c8] sm:$0xff]  ;;  %v3902_v31 = vpack.c.b16 %v459_v49, %v459_v49 }
 0x10b   : > { %v1756_v58 = vpop.f32.mrf.mxu0  ;;  %2010 = vmatpush.bf16.msra.mxu3 %v3147_v37  ;;  %v3155_v17 = vld [vmem:[%s4266_s1 + $0x208] sm:$0xff]  ;;  %v322_v37 = vld [vmem:[%s3427_s16 + $0xa4] sm:$0x1] }
 0x10c   : > { %1528 = vmatmul.bf16.gmra.mxu1 %v3864_v14  ;;  %1617 = vmatmul.bf16.gmra.mxu2 %v3884_v10  ;;  %v3892_v40 = vadd.f32 %v1753_v44, %v1665_v16  ;;  %v632_v28 = vshll.u32 %v3902_v31, 16  ;;  %v722_v16 = vrot.slane %v3591_v59, 1 }
 0x10d   : > { %1706 = vmatmul.bf16.gmra.mxu3 %v3591_v59  ;;  %2099 = vmatpush.bf16.msra.mxu0 %v3155_v17  ;;  %v460_v59 = vunpack.c.l.b16 %v322_v37 }
 0x10e   : > { %1795 = vmatmul.bf16.gmra.mxu0 %v3888_v24  ;;  %v634_v49 = vrot.slane %v632_v28, 1 }
 0x10f   : > { %v1578_v20 = vpop.f32.mrf.mxu2 }
 0x110   : > { %v1579_v26 = vadd.f32 %v1578_v20, %v1490_v38  ;;  %v1667_v44 = vpop.f32.mrf.mxu3  ;;  %v630_v38 = vor.u32 %v629_v1, %v625_v35  ;;  %v3932_v35 = vpack.c.b16 %v460_v59, %v460_v59  ;;  %v325_v59 = vld [vmem:[%s3427_s16 + $0xb0] sm:$0x1] }
 0x111   : > { %v1491_v48 = vpop.f32.mrf.mxu1 }
 0x112   : > { %v1668_v46 = vadd.f32 %v1667_v44, %v1579_v26  ;;  %v1492_v0 = vadd.f32 %v1491_v48, %v3781_v54  ;;  %v723_v54 = vrot.slane %v3872_v22, 1 }
 0x113   : > { %v1758_v52 = vpop.f32.mrf.mxu0 }
 0x114   : > { %v3914_v5 = vadd.f32 %v1756_v58, %v1668_v46  ;;  %v3920_v44 = vsel %vm688_vm1, %v722_v16, %v723_v54  ;;  %v3924_v58 = vsel %vm479_vm0, %v630_v38, %v634_v49  ;;  %v639_v46 = vshll.u32 %v3506_v32, 16 }
 0x115   : > { %v637_v16 = vshrl.u32 %v3506_v32, 16 }
 0x116   : > { %4294 = vst [vmem:[#allocation16_spill] sm:$0xff] %v3914_v5  ;;  %v641_v49 = vrot.slane %v639_v46, 1 }
 0x117   : > { %v1580_v33 = vpop.f32.mrf.mxu2 }
 0x118   : > { %v1581_v8 = vadd.f32 %v1580_v33, %v1492_v0  ;;  %v1669_v20 = vpop.f32.mrf.mxu3  ;;  %v644_v33 = vshll.u32 %v3932_v35, 16 }
 0x119   : > { %v1494_v26 = vpop.f32.mrf.mxu1 }
 0x11a   : > { %v1670_v48 = vadd.f32 %v1669_v20, %v1581_v8  ;;  %v1495_v7 = vadd.f32 %v1494_v26, %v3801_v25  ;;  %v725_v8 = vrot.slane %v3442_v12, 1  ;;  %v726_v20 = vrot.slane %v3902_v31, 1  ;;  %v3138_v31 = vld [vmem:[%s4266_s1 + $0x180] sm:$0xff] }
 0x11b   : > { %v1761_v17 = vpop.f32.mrf.mxu0  ;;  %v642_v26 = vor.u32 %v641_v49, %v637_v16  ;;  %1922 = vmatpush.bf16.msra.mxu2 %v3138_v31 }
 0x11c   : > { %1533 = vmatmul.bf16.gmra.mxu1 %v3888_v24  ;;  %1622 = vmatmul.bf16.gmra.mxu2 %v3920_v44  ;;  %v3928_v22 = vadd.f32 %v1758_v52, %v1670_v48  ;;  %v646_v48 = vrot.slane %v644_v33, 1 }
 0x11d   : > { %1711 = vmatmul.bf16.gmra.mxu3 %v3442_v12 }
 0x11e   : > { %4295 = vst [vmem:[#allocation17_spill] sm:$0xff] %v3928_v22  ;;  %1800 = vmatmul.bf16.gmra.mxu0 %v3924_v58 }
 0x11f   : > { %v1583_v25 = vpop.f32.mrf.mxu2 }
 0x120   : > { %v1584_v0 = vadd.f32 %v1583_v25, %v1495_v7  ;;  %v1672_v1 = vpop.f32.mrf.mxu3 }
 0x121   : > { %v1496_v28 = vpop.f32.mrf.mxu1 }
 0x122   : > { %v1673_v54 = vadd.f32 %v1672_v1, %v1584_v0  ;;  %v1497_v38 = vadd.f32 %v1496_v28, %v3817_v56  ;;  %v3944_v0 = vsel %vm688_vm1, %v725_v8, %v726_v20  ;;  %v3947_v1 = vsel %vm479_vm0, %v642_v26, %v646_v48 }
 0x123   : > { %v1763_v52 = vpop.f32.mrf.mxu0  ;;  %v649_v26 = vshrl.u32 %v3564_v50, 16 }
 0x124   : > { %v3938_v37 = vadd.f32 %v1761_v17, %v1673_v54  ;;  %v461_v17 = vunpack.c.l.b16 %v325_v59  ;;  %v651_v54 = vshll.u32 %v3564_v50, 16 }
 0x126   : > { %v3962_v16 = vpack.c.b16 %v461_v17, %v461_v17  ;;  %v653_v48 = vrot.slane %v651_v54, 1  ;;  %v328_v54 = vld [vmem:[%s3427_s16 + $0xbc] sm:$0x1] }
 0x127   : > { %v1585_v7 = vpop.f32.mrf.mxu2 }
 0x128   : > { %v1586_v25 = vadd.f32 %v1585_v7, %v1497_v38  ;;  %v1674_v22 = vpop.f32.mrf.mxu3  ;;  %v656_v7 = vshll.u32 %v3962_v16, 16  ;;  %v654_v31 = vor.u32 %v653_v48, %v649_v26 }
 0x129   : > { %v1499_v5 = vpop.f32.mrf.mxu1 }
 0x12a   : > { %v1675_v56 = vadd.f32 %v1674_v22, %v1586_v25  ;;  %v3146_v22 = vld [vmem:[%s4266_s1 + $0x1c0] sm:$0xff]  ;;  %v1500_v28 = vadd.f32 %v1499_v5, %v3682_v29  ;;  %v728_v25 = vrot.slane %v3506_v32, 1 }
 0x12b   : > { %v1766_v46 = vpop.f32.mrf.mxu0  ;;  %2011 = vmatpush.bf16.msra.mxu3 %v3146_v22  ;;  %v3130_v29 = vld [vmem:[%s4266_s1 + $0x140] sm:$0xff]  ;;  %v658_v22 = vrot.slane %v656_v7, 1 }
 0x12c   : > { %1538 = vmatmul.bf16.gmra.mxu1 %v3924_v58  ;;  %1627 = vmatmul.bf16.gmra.mxu2 %v3944_v0  ;;  %v3951_v12 = vadd.f32 %v1763_v52, %v1675_v56  ;;  %v3154_v5 = vld [vmem:[%s4266_s1 + $0x200] sm:$0xff]  ;;  %v729_v56 = vrot.slane %v3932_v35, 1 }
 0x12d   : > { %1716 = vmatmul.bf16.gmra.mxu3 %v3506_v32  ;;  %1833 = vmatpush.bf16.msra.mxu1 %v3130_v29  ;;  %v462_v32 = vunpack.c.l.b16 %v328_v54  ;;  %v731_v54 = vrot.slane %v3564_v50, 1 }
 0x12e   : > { %4296 = vst [vmem:[#allocation18_spill] sm:$0xff] %v3951_v12  ;;  %1805 = vmatmul.bf16.gmra.mxu0 %v3947_v1  ;;  %v3980_v12 = vsel %vm688_vm1, %v728_v25, %v729_v56 }
 0x12f   : > { %v1588_v38 = vpop.f32.mrf.mxu2  ;;  %2100 = vmatpush.bf16.msra.mxu0 %v3154_v5 }
 0x130   : > { %v1589_v52 = vadd.f32 %v1588_v38, %v1500_v28  ;;  %v1677_v49 = vpop.f32.mrf.mxu3 }
 0x131   : > { %v1501_v33 = vpop.f32.mrf.mxu1 }
 0x132   : > { %v1678_v8 = vadd.f32 %v1677_v49, %v1589_v52  ;;  %v1502_v17 = vadd.f32 %v1501_v33, %v3710_v45  ;;  %v478_v33 = vpack.c.b16 %v462_v32, %v462_v32  ;;  %v331_v32 = vld [vmem:[%s3427_s16 + $0xc8] sm:$0x1] }
 0x133   : > { %v1768_v20 = vpop.f32.mrf.mxu0 }
 0x134   : > { %v3973_v59 = vadd.f32 %v1766_v46, %v1678_v8  ;;  %v3983_v46 = vsel %vm479_vm0, %v654_v31, %v658_v22  ;;  %v663_v8 = vshll.u32 %v3594_v60, 16  ;;  %v661_v31 = vshrl.u32 %v3594_v60, 16 }
 0x135   : > { %v668_v22 = vshll.u32 %v478_v33, 16 }
 0x137   : > { %v1590_v28 = vpop.f32.mrf.mxu2 }
 0x138   : > { %v1591_v38 = vadd.f32 %v1590_v28, %v1502_v17  ;;  %v1679_v52 = vpop.f32.mrf.mxu3 }
 0x139   : > { %v1504_v49 = vpop.f32.mrf.mxu1 }
 0x13a   : > { %v1680_v29 = vadd.f32 %v1679_v52, %v1591_v38  ;;  %v1505_v35 = vadd.f32 %v1504_v49, %v3724_v3  ;;  %v732_v3 = vrot.slane %v3962_v16, 1  ;;  %v670_v49 = vrot.slane %v668_v22, 1 }
 0x13b   : > { %v1771_v5 = vpop.f32.mrf.mxu0  ;;  %v760_v16 = vunpack.c.l.b16 %v331_v32 }
 0x13c   : > { %1543 = vmatmul.bf16.gmra.mxu1 %v3947_v1  ;;  %1632 = vmatmul.bf16.gmra.mxu2 %v3980_v12  ;;  %v3987_v45 = vadd.f32 %v1768_v20, %v1680_v29  ;;  %v665_v20 = vrot.slane %v663_v8, 1 }
 0x13d   : > { %1721 = vmatmul.bf16.gmra.mxu3 %v3564_v50  ;;  %v4007_v50 = vld [vmem:[%s3427_s16 + $0xc0] sm:$0xff] }
 0x13e   : > { %4297 = vst [vmem:[#allocation19_spill] sm:$0xff] %v3987_v45  ;;  %1810 = vmatmul.bf16.gmra.mxu0 %v3983_v46  ;;  %v666_v52 = vor.u32 %v665_v20, %v661_v31  ;;  %v765_v31 = vshll.u32 %v4007_v50, 16 }
 0x13f   : > { %v1593_v26 = vpop.f32.mrf.mxu2 }
 0x140   : > { %v1594_v48 = vadd.f32 %v1593_v26, %v1505_v35  ;;  %v1682_v7 = vpop.f32.mrf.mxu3 }
 0x141   : > { %v1506_v25 = vpop.f32.mrf.mxu1 }
 0x142   : > { %v1683_v56 = vadd.f32 %v1682_v7, %v1594_v48  ;;  %v1507_v38 = vadd.f32 %v1506_v25, %v3743_v15  ;;  %v4001_v7 = vsel %vm688_vm1, %v731_v54, %v732_v3 }
 0x143   : > { %v1773_v17 = vpop.f32.mrf.mxu0 }
 0x144   : > { %v3994_v28 = vadd.f32 %v1771_v5, %v1683_v56  ;;  %v4004_v5 = vsel %vm479_vm0, %v666_v52, %v670_v49  ;;  %v4016_v56 = vpack.c.b16 %v760_v16, %v760_v16  ;;  %v763_v49 = vshrl.u32 %v4007_v50, 16 }
 0x146   : > { %4299 = vst [vmem:[#allocation21_spill] sm:$0xff] %v4016_v56 }
 0x147   : > { %v1595_v29 = vpop.f32.mrf.mxu2 }
 0x148   : > { %v1596_v35 = vadd.f32 %v1595_v29, %v1507_v38  ;;  %v1684_v26 = vpop.f32.mrf.mxu3  ;;  %v770_v29 = vshll.u32 %v4016_v56, 16 }
 0x149   : > { %v1509_v48 = vpop.f32.mrf.mxu1 }
 0x14a   : > { %v1685_v8 = vadd.f32 %v1684_v26, %v1596_v35  ;;  %v1510_v25 = vadd.f32 %v1509_v48, %v3754_v27  ;;  %v734_v35 = vrot.slane %v3594_v60, 1  ;;  %v735_v27 = vrot.slane %v478_v33, 1 }
 0x14b   : > { %v1776_v45 = vpop.f32.mrf.mxu0 }
 0x14c   : > { %1548 = vmatmul.bf16.gmra.mxu1 %v3983_v46  ;;  %1637 = vmatmul.bf16.gmra.mxu2 %v4001_v7  ;;  %v4011_v15 = vadd.f32 %v1773_v17, %v1685_v8  ;;  %v767_v17 = vrot.slane %v765_v31, 1  ;;  %v772_v8 = vrot.slane %v770_v29, 1 }
 0x14d   : > { %1726 = vmatmul.bf16.gmra.mxu3 %v3594_v60 }
 0x14e   : > { %4298 = vst [vmem:[#allocation20_spill] sm:$0xff] %v4011_v15  ;;  %1815 = vmatmul.bf16.gmra.mxu0 %v4004_v5  ;;  %v768_v48 = vor.u32 %v767_v17, %v763_v49 }
 0x14f   : > { %v1598_v20 = vpop.f32.mrf.mxu2 }
 0x150   : > { %v1599_v22 = vadd.f32 %v1598_v20, %v1510_v25  ;;  %v1687_v54 = vpop.f32.mrf.mxu3  ;;  %v4029_v56 = vsel %vm479_vm0, %v768_v48, %v772_v8 }
 0x151   : > { %v1511_v3 = vpop.f32.mrf.mxu1 }
 0x152   : > { %v1688_v38 = vadd.f32 %v1687_v54, %v1599_v22  ;;  %v1512_v26 = vadd.f32 %v1511_v3, %v3779_v53  ;;  %v4026_v22 = vsel %vm688_vm1, %v734_v35, %v735_v27 }
 0x153   : > { %v1778_v52 = vpop.f32.mrf.mxu0 }
 0x154   : > { %v4021_v32 = vadd.f32 %v1776_v45, %v1688_v38 }
 0x157   : > { %v1600_v16 = vpop.f32.mrf.mxu2 }
 0x158   : > { %v1601_v25 = vadd.f32 %v1600_v16, %v1512_v26  ;;  %v1689_v20 = vpop.f32.mrf.mxu3 }
 0x159   : > { %v1514_v15 = vpop.f32.mrf.mxu1 }
 0x15a   : > { %v1690_v54 = vadd.f32 %v1689_v20, %v1601_v25  ;;  %v1515_v53 = vadd.f32 %v1514_v15, %v3796_v23  ;;  %v3307_v23 = vld [vmem:[%s3427_s16 + $0x18] sm:$0xff] }
 0x15b   : > { %v1781_v31 = vpop.f32.mrf.mxu0 }
 0x15c   : > { %1553 = vmatmul.bf16.gmra.mxu1 %v4004_v5  ;;  %1642 = vmatmul.bf16.gmra.mxu2 %v4026_v22  ;;  %v4033_v60 = vadd.f32 %v1778_v52, %v1690_v54 }
 0x15d   : > { %1731 = vmatmul.bf16.gmra.mxu3 %v4007_v50 }
 0x15e   : > { %1820 = vmatmul.bf16.gmra.mxu0 %v4029_v56 }
 0x15f   : > { %v1603_v45 = vpop.f32.mrf.mxu2 }
 0x160   : > { %v1604_v33 = vadd.f32 %v1603_v45, %v1515_v53  ;;  %v1692_v3 = vpop.f32.mrf.mxu3 }
 0x161   : > { %v1516_v38 = vpop.f32.mrf.mxu1 }
 0x162   : > { %v1693_v49 = vadd.f32 %v1692_v3, %v1604_v33  ;;  %v1517_v35 = vadd.f32 %v1516_v38, %v3815_v55 }
 0x163   : > { %v1783_v17 = vpop.f32.mrf.mxu0 }
 0x164   : > { %v4038_v29 = vadd.f32 %v1781_v31, %v1693_v49 }
 0x167   : > { %v1605_v27 = vpop.f32.mrf.mxu2 }
 0x168   : > { %v1606_v52 = vadd.f32 %v1605_v27, %v1517_v35  ;;  %v1694_v26 = vpop.f32.mrf.mxu3 }
 0x169   : > { %v1519_v48 = vpop.f32.mrf.mxu1 }
 0x16a   : > { %v1695_v8 = vadd.f32 %v1694_v26, %v1606_v52  ;;  %v1520_v25 = vadd.f32 %v1519_v48, %v3703_v41  ;;  %v3308_v41 = vld [vmem:[%s3427_s16 + $0x24] sm:$0xff] }
 0x16b   : > { %v1786_v16 = vpop.f32.mrf.mxu0 }
 0x16c   : > { %1834 = vmatmul.bf16.vlgmr.msra.gmra.mxu1 %v3630_v42  ;;  %1923 = vmatmul.bf16.vlgmr.msra.gmra.mxu2 %v3307_v23  ;;  %v4043_v15 = vadd.f32 %v1783_v17, %v1695_v8 }
 0x16d   : > { %2012 = vmatmul.bf16.vlgmr.msra.gmra.mxu3 %v3633_v43 }
 0x16e   : > { %2101 = vmatmul.bf16.vlgmr.msra.gmra.mxu0 %v3643_v62 }
 0x16f   : > { %v1608_v55 = vpop.f32.mrf.mxu2 }
 0x170   : > { %v1609_v20 = vadd.f32 %v1608_v55, %v1520_v25  ;;  %v1697_v54 = vpop.f32.mrf.mxu3 }
 0x171   : > { %v1521_v31 = vpop.f32.mrf.mxu1 }
 0x172   : > { %v1698_v53 = vadd.f32 %v1697_v54, %v1609_v20  ;;  %v1522_v42 = vadd.f32 %v1521_v31, %v3719_v51 }
 0x173   : > { %v1788_v45 = vpop.f32.mrf.mxu0 }
 0x174   : > { %v4048_v33 = vadd.f32 %v1786_v16, %v1698_v53 }
 0x177   : > { %v1610_v3 = vpop.f32.mrf.mxu2 }
 0x178   : > { %v1611_v38 = vadd.f32 %v1610_v3, %v1522_v42  ;;  %v1699_v49 = vpop.f32.mrf.mxu3 }
 0x179   : > { %v1524_v17 = vpop.f32.mrf.mxu1 }
 0x17a   : > { %v1700_v43 = vadd.f32 %v1699_v49, %v1611_v38  ;;  %v1525_v52 = vadd.f32 %v1524_v17, %v3739_v9  ;;  %v3309_v9 = vld [vmem:[%s3427_s16 + $0x30] sm:$0xff] }
 0x17b   : > { %v1791_v35 = vpop.f32.mrf.mxu0 }
 0x17c   : > { %1839 = vmatmul.bf16.gmra.mxu1 %v3643_v62  ;;  %1928 = vmatmul.bf16.gmra.mxu2 %v3308_v41  ;;  %v4053_v27 = vadd.f32 %v1788_v45, %v1700_v43 }
 0x17d   : > { %2017 = vmatmul.bf16.gmra.mxu3 %v3646_v63 }
 0x17e   : > { %2106 = vmatmul.bf16.gmra.mxu0 %v3669_v18 }
 0x17f   : > { %v1613_v51 = vpop.f32.mrf.mxu2 }
 0x180   : > { %v1614_v26 = vadd.f32 %v1613_v51, %v1525_v52  ;;  %v1702_v48 = vpop.f32.mrf.mxu3 }
 0x181   : > { %v1526_v8 = vpop.f32.mrf.mxu1 }
 0x182   : > { %v1703_v16 = vadd.f32 %v1702_v48, %v1614_v26  ;;  %v1527_v62 = vadd.f32 %v1526_v8, %v3749_v13 }
 0x183   : > { %v1793_v23 = vpop.f32.mrf.mxu0 }
 0x184   : > { %v4058_v25 = vadd.f32 %v1791_v35, %v1703_v16 }
 0x187   : > { %v1615_v55 = vpop.f32.mrf.mxu2 }
 0x188   : > { %v1616_v20 = vadd.f32 %v1615_v55, %v1527_v62  ;;  %v1704_v54 = vpop.f32.mrf.mxu3 }
 0x189   : > { %v1529_v31 = vpop.f32.mrf.mxu1 }
 0x18a   : > { %v1705_v63 = vadd.f32 %v1704_v54, %v1616_v20  ;;  %v1530_v42 = vadd.f32 %v1529_v31, %v3775_v47  ;;  %v3310_v47 = vld [vmem:[%s3427_s16 + $0x3c] sm:$0xff] }
 0x18b   : > { %v1796_v53 = vpop.f32.mrf.mxu0 }
 0x18c   : > { %1844 = vmatmul.bf16.gmra.mxu1 %v3669_v18  ;;  %1933 = vmatmul.bf16.gmra.mxu2 %v3309_v9  ;;  %v4063_v45 = vadd.f32 %v1793_v23, %v1705_v63 }
 0x18d   : > { %2022 = vmatmul.bf16.gmra.mxu3 %v3672_v19 }
 0x18e   : > { %2111 = vmatmul.bf16.gmra.mxu0 %v3685_v34 }
 0x18f   : > { %v1618_v13 = vpop.f32.mrf.mxu2 }
 0x190   : > { %v1619_v3 = vadd.f32 %v1618_v13, %v1530_v42  ;;  %v1707_v38 = vpop.f32.mrf.mxu3 }
 0x191   : > { %v1531_v49 = vpop.f32.mrf.mxu1 }
 0x192   : > { %v1708_v17 = vadd.f32 %v1707_v38, %v1619_v3  ;;  %v1532_v18 = vadd.f32 %v1531_v49, %v3791_v61  ;;  %v4300_v38 = vld [vmem:[#allocation6_spill] sm:$0xff] }
 0x193   : > { %v1798_v43 = vpop.f32.mrf.mxu0  ;;  %v4301_v49 = vld [vmem:[#allocation2_spill] sm:$0xff] }
 0x194   : > { %v4068_v35 = vadd.f32 %v1796_v53, %v1708_v17 }
 0x197   : > { %v1620_v41 = vpop.f32.mrf.mxu2 }
 0x198   : > { %v1621_v52 = vadd.f32 %v1620_v41, %v1532_v18  ;;  %v1709_v51 = vpop.f32.mrf.mxu3 }
 0x199   : > { %v1534_v26 = vpop.f32.mrf.mxu1 }
 0x19a   : > { %v1710_v19 = vadd.f32 %v1709_v51, %v1621_v52  ;;  %v1535_v16 = vadd.f32 %v1534_v26, %v3811_v39  ;;  %v3311_v39 = vld [vmem:[%s3427_s16 + $0x48] sm:$0xff] }
 0x19b   : > { %v1801_v48 = vpop.f32.mrf.mxu0 }
 0x19c   : > { %1849 = vmatmul.bf16.gmra.mxu1 %v3685_v34  ;;  %1938 = vmatmul.bf16.gmra.mxu2 %v3310_v47  ;;  %v4073_v8 = vadd.f32 %v1798_v43, %v1710_v19 }
 0x19d   : > { %2027 = vmatmul.bf16.gmra.mxu3 %v3690_v36 }
 0x19e   : > { %2116 = vmatmul.bf16.gmra.mxu0 %v3727_v4 }
 0x19f   : > { %v1623_v61 = vpop.f32.mrf.mxu2 }
 0x1a0   : > { %v1624_v23 = vadd.f32 %v1623_v61, %v1535_v16  ;;  %v1712_v62 = vpop.f32.mrf.mxu3 }
 0x1a1   : > { %v1536_v55 = vpop.f32.mrf.mxu1 }
 0x1a2   : > { %v1713_v20 = vadd.f32 %v1712_v62, %v1624_v23  ;;  %v1537_v34 = vadd.f32 %v1536_v55, %v3821_v21  ;;  %v3312_v62 = vld [vmem:[%s3427_s16 + $0x54] sm:$0xff] }
 0x1a3   : > { %v1803_v54 = vpop.f32.mrf.mxu0 }
 0x1a4   : > { %v4078_v31 = vadd.f32 %v1801_v48, %v1713_v20  ;;  %v4303_v20 = vld [vmem:[#allocation7_spill] sm:$0xff] }
 0x1a7   : > { %v1625_v63 = vpop.f32.mrf.mxu2 }
 0x1a8   : > { %v1626_v53 = vadd.f32 %v1625_v63, %v1537_v34  ;;  %v1714_v9 = vpop.f32.mrf.mxu3  ;;  %v4305_v34 = vld [vmem:[#allocation4_spill] sm:$0xff] }
 0x1a9   : > { %v1539_v42 = vpop.f32.mrf.mxu1 }
 0x1aa   : > { %v1715_v36 = vadd.f32 %v1714_v9, %v1626_v53  ;;  %v1540_v17 = vadd.f32 %v1539_v42, %v4301_v49 }
 0x1ab   : > { %v1806_v13 = vpop.f32.mrf.mxu0 }
 0x1ac   : > { %1854 = vmatmul.bf16.gmra.mxu1 %v3727_v4  ;;  %1943 = vmatmul.bf16.gmra.mxu2 %v3311_v39  ;;  %v4083_v3 = vadd.f32 %v1803_v54, %v1715_v36  ;;  %v4302_v4 = vld [vmem:[#allocation3_spill] sm:$0xff]  ;;  %v4304_v54 = vld [vmem:[#allocation10_spill] sm:$0xff] }
 0x1ad   : > { %2032 = vmatmul.bf16.gmra.mxu3 %v3732_v6 }
 0x1ae   : > { %2121 = vmatmul.bf16.gmra.mxu0 %v4300_v38 }
 0x1af   : > { %v1628_v21 = vpop.f32.mrf.mxu2 }
 0x1b0   : > { %v1629_v43 = vadd.f32 %v1628_v21, %v1540_v17  ;;  %v1717_v18 = vpop.f32.mrf.mxu3 }
 0x1b1   : > { %v1541_v41 = vpop.f32.mrf.mxu1 }
 0x1b2   : > { %v1718_v52 = vadd.f32 %v1717_v18, %v1629_v43  ;;  %v1542_v19 = vadd.f32 %v1541_v41, %v4302_v4  ;;  %v3313_v4 = vld [vmem:[%s3427_s16 + $0x60] sm:$0xff] }
 0x1b3   : > { %v1808_v51 = vpop.f32.mrf.mxu0 }
 0x1b4   : > { %v4088_v26 = vadd.f32 %v1806_v13, %v1718_v52 }
 0x1b7   : > { %v1630_v48 = vpop.f32.mrf.mxu2 }
 0x1b8   : > { %v1631_v47 = vadd.f32 %v1630_v48, %v1542_v19  ;;  %v1719_v16 = vpop.f32.mrf.mxu3  ;;  %v4307_v48 = vld [vmem:[#allocation11_spill] sm:$0xff] }
 0x1b9   : > { %v1544_v61 = vpop.f32.mrf.mxu1 }
 0x1ba   : > { %v1720_v6 = vadd.f32 %v1719_v16, %v1631_v47  ;;  %v1545_v63 = vadd.f32 %v1544_v61, %v4305_v34  ;;  %v4308_v47 = vld [vmem:[#allocation14_spill] sm:$0xff]  ;;  %v4309_v16 = vld [vmem:[#allocation8_spill] sm:$0xff] }
 0x1bb   : > { %v1811_v23 = vpop.f32.mrf.mxu0 }
 0x1bc   : > { %1859 = vmatmul.bf16.gmra.mxu1 %v4300_v38  ;;  %1948 = vmatmul.bf16.gmra.mxu2 %v3312_v62  ;;  %v4093_v55 = vadd.f32 %v1808_v51, %v1720_v6  ;;  %v4306_v38 = vld [vmem:[#allocation5_spill] sm:$0xff] }
 0x1bd   : > { %2037 = vmatmul.bf16.gmra.mxu3 %v4303_v20 }
 0x1be   : > { %2126 = vmatmul.bf16.gmra.mxu0 %v4304_v54 }
 0x1bf   : > { %v1633_v53 = vpop.f32.mrf.mxu2 }
 0x1c0   : > { %v1634_v9 = vadd.f32 %v1633_v53, %v1545_v63  ;;  %v1722_v42 = vpop.f32.mrf.mxu3 }
 0x1c1   : > { %v1546_v36 = vpop.f32.mrf.mxu1 }
 0x1c2   : > { %v1723_v13 = vadd.f32 %v1722_v42, %v1634_v9  ;;  %v1547_v17 = vadd.f32 %v1546_v36, %v4306_v38 }
 0x1c3   : > { %v1813_v39 = vpop.f32.mrf.mxu0 }
 0x1c4   : > { %v4098_v49 = vadd.f32 %v1811_v23, %v1723_v13 }
 0x1c7   : > { %v1635_v21 = vpop.f32.mrf.mxu2 }
 0x1c8   : > { %v1636_v43 = vadd.f32 %v1635_v21, %v1547_v17  ;;  %v1724_v18 = vpop.f32.mrf.mxu3  ;;  %v3314_v21 = vld [vmem:[%s3427_s16 + $0x6c] sm:$0xff] }
 0x1c9   : > { %v1549_v41 = vpop.f32.mrf.mxu1 }
 0x1ca   : > { %v1725_v52 = vadd.f32 %v1724_v18, %v1636_v43  ;;  %v1550_v61 = vadd.f32 %v1549_v41, %v4309_v16  ;;  %v4311_v18 = vld [vmem:[#allocation12_spill] sm:$0xff] }
 0x1cb   : > { %v1816_v51 = vpop.f32.mrf.mxu0 }
 0x1cc   : > { %1864 = vmatmul.bf16.gmra.mxu1 %v4304_v54  ;;  %1953 = vmatmul.bf16.gmra.mxu2 %v3313_v4  ;;  %v4103_v19 = vadd.f32 %v1813_v39, %v1725_v52  ;;  %v4310_v54 = vld [vmem:[#allocation9_spill] sm:$0xff] }
 0x1cd   : > { %2042 = vmatmul.bf16.gmra.mxu3 %v4307_v48 }
 0x1ce   : > { %2131 = vmatmul.bf16.gmra.mxu0 %v4308_v47 }
 0x1cf   : > { %v1638_v6 = vpop.f32.mrf.mxu2 }
 0x1d0   : > { %v1639_v23 = vadd.f32 %v1638_v6, %v1550_v61  ;;  %v1727_v62 = vpop.f32.mrf.mxu3 }
 0x1d1   : > { %v1551_v20 = vpop.f32.mrf.mxu1 }
 0x1d2   : > { %v1728_v34 = vadd.f32 %v1727_v62, %v1639_v23  ;;  %v1552_v9 = vadd.f32 %v1551_v20, %v4310_v54 }
 0x1d3   : > { %v1818_v63 = vpop.f32.mrf.mxu0 }
 0x1d4   : > { %v4108_v53 = vadd.f32 %v1816_v51, %v1728_v34 }
 0x1d7   : > { %v1640_v42 = vpop.f32.mrf.mxu2 }
 0x1d8   : > { %v1641_v36 = vadd.f32 %v1640_v42, %v1552_v9  ;;  %v1729_v13 = vpop.f32.mrf.mxu3  ;;  %v3315_v9 = vld [vmem:[%s3427_s16 + $0x78] sm:$0xff] }
 0x1d9   : > { %v1554_v39 = vpop.f32.mrf.mxu1 }
 0x1da   : > { %v1730_v38 = vadd.f32 %v1729_v13, %v1641_v36  ;;  %v1555_v41 = vadd.f32 %v1554_v39, %v4311_v18 }
 0x1db   : > { %v1821_v17 = vpop.f32.mrf.mxu0 }
 0x1dc   : > { %1869 = vmatmul.bf16.gmra.mxu1 %v4308_v47  ;;  %1958 = vmatmul.bf16.gmra.mxu2 %v3314_v21  ;;  %v4113_v43 = vadd.f32 %v1818_v63, %v1730_v38  ;;  %v4312_v47 = vld [vmem:[#allocation13_spill] sm:$0xff] }
 0x1dd   : > { %2047 = vmatmul.bf16.gmra.mxu3 %v3831_v30 }
 0x1de   : > { %2136 = vmatmul.bf16.gmra.mxu0 %v3860_v2 }
 0x1df   : > { %v1643_v52 = vpop.f32.mrf.mxu2 }
 0x1e0   : > { %v1644_v51 = vadd.f32 %v1643_v52, %v1555_v41  ;;  %v1732_v4 = vpop.f32.mrf.mxu3  ;;  %v4313_v41 = vld [vmem:[#allocation15_spill] sm:$0xff] }
 0x1e1   : > { %v1556_v48 = vpop.f32.mrf.mxu1 }
 0x1e2   : > { %v1733_v16 = vadd.f32 %v1732_v4, %v1644_v51  ;;  %v1557_v23 = vadd.f32 %v1556_v48, %v4312_v47 }
 0x1e3   : > { %v1823_v61 = vpop.f32.mrf.mxu0 }
 0x1e4   : > { %v4118_v6 = vadd.f32 %v1821_v17, %v1733_v16 }
 0x1e7   : > { %v1645_v62 = vpop.f32.mrf.mxu2 }
 0x1e8   : > { %v1646_v20 = vadd.f32 %v1645_v62, %v1557_v23  ;;  %v1734_v34 = vpop.f32.mrf.mxu3  ;;  %v3316_v23 = vld [vmem:[%s3427_s16 + $0x84] sm:$0xff] }
 0x1e9   : > { %v1835_v63 = vpop.f32.mrf.mxu1 }
 0x1ea   : > { %v1735_v30 = vadd.f32 %v1734_v34, %v1646_v20  ;;  %v1836_v36 = vadd.f32 %v1835_v63, %v3855_v11 }
 0x1eb   : > { %v2102_v54 = vpop.f32.mrf.mxu0 }
 0x1ec   : > { %1874 = vmatmul.bf16.gmra.mxu1 %v3860_v2  ;;  %1963 = vmatmul.bf16.gmra.mxu2 %v3315_v9  ;;  %v4123_v42 = vadd.f32 %v1823_v61, %v1735_v30 }
 0x1ed   : > { %2052 = vmatmul.bf16.gmra.mxu3 %v3864_v14  ;;  %v4132_v14 = vld [vmem:[%s4267_s2] ss:$0 sm:$0xff] }
 0x1ee   : > { %2141 = vmatmul.bf16.gmra.mxu0 %v3884_v10 }
 0x1ef   : > { %v1924_v13 = vpop.f32.mrf.mxu2 }
 0x1f0   : > { %v2013_v39 = vpop.f32.mrf.mxu3  ;;  %v1925_v38 = vadd.f32 %v1924_v13, %v1836_v36 }
 0x1f1   : > { %v1837_v17 = vpop.f32.mrf.mxu1 }
 0x1f2   : > { %v2014_v18 = vadd.f32 %v2013_v39, %v1925_v38  ;;  %v1838_v2 = vadd.f32 %v1837_v17, %v4313_v41 }
 0x1f3   : > { %v2104_v21 = vpop.f32.mrf.mxu0 }
 0x1f4   : > { %v2103_v48 = vadd.f32 %v2102_v54, %v2014_v18 }
 0x1f6   : > { %v2186_v62 = vadd.f32 %v4132_v14, %v2103_v48  ;;  %v2486_v20 = vmul.f32 %v2103_v48, %v2103_v48 }
 0x1f7   : > { %v1926_v52 = vpop.f32.mrf.mxu2 }
 0x1f8   : > { %v1927_v51 = vadd.f32 %v1926_v52, %v1838_v2  ;;  %v2015_v4 = vpop.f32.mrf.mxu3 }
 0x1f9   : > { %v1840_v11 = vpop.f32.mrf.mxu1 }
 0x1fa   : > { %v2016_v16 = vadd.f32 %v2015_v4, %v1927_v51  ;;  %v1841_v54 = vadd.f32 %v1840_v11, %v3878_v57 }
 0x1fb   : > { %v2107_v61 = vpop.f32.mrf.mxu0 }
 0x1fc   : > { %v2105_v47 = vadd.f32 %v2104_v21, %v2016_v16  ;;  %1879 = vmatmul.bf16.gmra.mxu1 %v3884_v10  ;;  %1968 = vmatmul.bf16.gmra.mxu2 %v3316_v23  ;;  %v3317_v23 = vld [vmem:[%s3427_s16 + $0x90] sm:$0xff] }
 0x1fd   : > { %2057 = vmatmul.bf16.gmra.mxu3 %v3888_v24 }
 0x1fe   : > { %2146 = vmatmul.bf16.gmra.mxu0 %v3920_v44  ;;  %v2187_v34 = vadd.f32 %v4132_v14, %v2105_v47  ;;  %v2448_v63 = vadd.f32 %v2105_v47, %v2103_v48  ;;  %v2487_v30 = vmul.f32 %v2105_v47, %v2105_v47 }
 0x1ff   : > { %v1929_v10 = vpop.f32.mrf.mxu2 }
 0x200   : > { %v3165_v9 = vpack.c.bf16 %v2187_v34, %v2186_v62  ;;  %v2518_v36 = vadd.f32 %v2487_v30, %v2486_v20  ;;  %v1930_v13 = vadd.f32 %v1929_v10, %v1841_v54  ;;  %v2018_v39 = vpop.f32.mrf.mxu3  ;;  %v4314_v34 = vld [vmem:[#allocation16_spill] sm:$0xff] }
 0x201   : > { %v1842_v24 = vpop.f32.mrf.mxu1 }
 0x202   : > { %3166 = vst [vmem:[%s4145_s9] sm:$0xff] %v3165_v9   ;;  %v2019_v38 = vadd.f32 %v2018_v39, %v1930_v13  ;;  %v1843_v57 = vadd.f32 %v1842_v24, %v3892_v40 }
 0x203   : > { %v2109_v17 = vpop.f32.mrf.mxu0 }
 0x204   : > { %v2108_v21 = vadd.f32 %v2107_v61, %v2019_v38 }
 0x206   : > { %v2449_v18 = vadd.f32 %v2448_v63, %v2108_v21  ;;  %v2488_v41 = vmul.f32 %v2108_v21, %v2108_v21  ;;  %v2188_v62 = vadd.f32 %v4132_v14, %v2108_v21 }
 0x207   : > { %v1931_v2 = vpop.f32.mrf.mxu2 }
 0x208   : > { %v2519_v52 = vadd.f32 %v2518_v36, %v2488_v41  ;;  %v1932_v51 = vadd.f32 %v1931_v2, %v1843_v57  ;;  %v2020_v4 = vpop.f32.mrf.mxu3 }
 0x209   : > { %v1845_v48 = vpop.f32.mrf.mxu1 }
 0x20a   : > { %v2021_v11 = vadd.f32 %v2020_v4, %v1932_v51  ;;  %v1846_v63 = vadd.f32 %v1845_v48, %v4314_v34 }
 0x20b   : > { %v2112_v16 = vpop.f32.mrf.mxu0 }
 0x20c   : > { %v2110_v47 = vadd.f32 %v2109_v17, %v2021_v11  ;;  %1884 = vmatmul.bf16.gmra.mxu1 %v3920_v44  ;;  %1973 = vmatmul.bf16.gmra.mxu2 %v3317_v23  ;;  %v4315_v17 = vld [vmem:[#allocation17_spill] sm:$0xff] }
 0x20d   : > { %2062 = vmatmul.bf16.gmra.mxu3 %v3924_v58  ;;  %v3318_v11 = vld [vmem:[%s3427_s16 + $0x9c] sm:$0xff] }
 0x20e   : > { %2151 = vmatmul.bf16.gmra.mxu0 %v3944_v0  ;;  %v2189_v40 = vadd.f32 %v4132_v14, %v2110_v47  ;;  %v2450_v61 = vadd.f32 %v2449_v18, %v2110_v47  ;;  %v2489_v20 = vmul.f32 %v2110_v47, %v2110_v47 }
 0x20f   : > { %v1934_v30 = vpop.f32.mrf.mxu2 }
 0x210   : > { %v3170_v54 = vpack.c.bf16 %v2189_v40, %v2188_v62  ;;  %v2520_v10 = vadd.f32 %v2519_v52, %v2489_v20  ;;  %v1935_v9 = vadd.f32 %v1934_v30, %v1846_v63  ;;  %v2023_v44 = vpop.f32.mrf.mxu3 }
 0x211   : > { %v1847_v36 = vpop.f32.mrf.mxu1 }
 0x212   : > { %3242 = vst [vmem:[%s4145_s9 + $0x8] sm:$0xff] %v3170_v54   ;;  %v2024_v13 = vadd.f32 %v2023_v44, %v1935_v9  ;;  %v1848_v21 = vadd.f32 %v1847_v36, %v4315_v17  ;;  %v4316_v36 = vld [vmem:[#allocation18_spill] sm:$0xff] }
 0x213   : > { %v2114_v39 = vpop.f32.mrf.mxu0 }
 0x214   : > { %v2113_v24 = vadd.f32 %v2112_v16, %v2024_v13 }
 0x216   : > { %v2451_v58 = vadd.f32 %v2450_v61, %v2113_v24  ;;  %v2490_v38 = vmul.f32 %v2113_v24, %v2113_v24  ;;  %v2190_v47 = vadd.f32 %v4132_v14, %v2113_v24 }
 0x217   : > { %v1936_v41 = vpop.f32.mrf.mxu2 }
 0x218   : > { %v2521_v18 = vadd.f32 %v2520_v10, %v2490_v38  ;;  %v1937_v57 = vadd.f32 %v1936_v41, %v1848_v21  ;;  %v2025_v2 = vpop.f32.mrf.mxu3 }
 0x219   : > { %v1850_v51 = vpop.f32.mrf.mxu1 }
 0x21a   : > { %v2026_v4 = vadd.f32 %v2025_v2, %v1937_v57  ;;  %v1851_v40 = vadd.f32 %v1850_v51, %v3938_v37 }
 0x21b   : > { %v2117_v48 = vpop.f32.mrf.mxu0 }
 0x21c   : > { %v2115_v52 = vadd.f32 %v2114_v39, %v2026_v4  ;;  %1889 = vmatmul.bf16.gmra.mxu1 %v3944_v0  ;;  %1978 = vmatmul.bf16.gmra.mxu2 %v3318_v11 }
 0x21d   : > { %2067 = vmatmul.bf16.gmra.mxu3 %v3947_v1 }
 0x21e   : > { %2156 = vmatmul.bf16.gmra.mxu0 %v3980_v12  ;;  %v2191_v16 = vadd.f32 %v4132_v14, %v2115_v52  ;;  %v2452_v23 = vadd.f32 %v2451_v58, %v2115_v52  ;;  %v2491_v62 = vmul.f32 %v2115_v52, %v2115_v52 }
 0x21f   : > { %v1939_v61 = vpop.f32.mrf.mxu2 }
 0x220   : > { %v3175_v20 = vpack.c.bf16 %v2191_v16, %v2190_v47  ;;  %v2522_v34 = vadd.f32 %v2521_v18, %v2491_v62  ;;  %v1940_v63 = vadd.f32 %v1939_v61, %v1851_v40  ;;  %v2028_v0 = vpop.f32.mrf.mxu3  ;;  %v3319_v18 = vld [vmem:[%s3427_s16 + $0xa8] sm:$0xff] }
 0x221   : > { %v1852_v30 = vpop.f32.mrf.mxu1 }
 0x222   : > { %3243 = vst [vmem:[%s4145_s9 + $0x10] sm:$0xff] %v3175_v20   ;;  %v2029_v54 = vadd.f32 %v2028_v0, %v1940_v63  ;;  %v1853_v13 = vadd.f32 %v1852_v30, %v4316_v36  ;;  %v3320_v36 = vld [vmem:[%s3427_s16 + $0xb4] sm:$0xff] }
 0x223   : > { %v2119_v10 = vpop.f32.mrf.mxu0 }
 0x224   : > { %v2118_v9 = vadd.f32 %v2117_v48, %v2029_v54 }
 0x226   : > { %v2453_v1 = vadd.f32 %v2452_v23, %v2118_v9  ;;  %v2492_v44 = vmul.f32 %v2118_v9, %v2118_v9  ;;  %v2192_v57 = vadd.f32 %v4132_v14, %v2118_v9 }
 0x227   : > { %v1941_v39 = vpop.f32.mrf.mxu2 }
 0x228   : > { %v2523_v24 = vadd.f32 %v2522_v34, %v2492_v44  ;;  %v1942_v58 = vadd.f32 %v1941_v39, %v1853_v13  ;;  %v2030_v38 = vpop.f32.mrf.mxu3  ;;  %v4317_v34 = vld [vmem:[#allocation19_spill] sm:$0xff] }
 0x229   : > { %v1855_v37 = vpop.f32.mrf.mxu1 }
 0x22a   : > { %v2031_v17 = vadd.f32 %v2030_v38, %v1942_v58  ;;  %v1856_v48 = vadd.f32 %v1855_v37, %v3973_v59 }
 0x22b   : > { %v2122_v21 = vpop.f32.mrf.mxu0 }
 0x22c   : > { %v2120_v41 = vadd.f32 %v2119_v10, %v2031_v17  ;;  %1894 = vmatmul.bf16.gmra.mxu1 %v3980_v12  ;;  %1983 = vmatmul.bf16.gmra.mxu2 %v3319_v18 }
 0x22d   : > { %2072 = vmatmul.bf16.gmra.mxu3 %v3983_v46 }
 0x22e   : > { %2161 = vmatmul.bf16.gmra.mxu0 %v4001_v7  ;;  %v2193_v2 = vadd.f32 %v4132_v14, %v2120_v41  ;;  %v2454_v51 = vadd.f32 %v2453_v1, %v2120_v41  ;;  %v2493_v4 = vmul.f32 %v2120_v41, %v2120_v41 }
 0x22f   : > { %v1944_v52 = vpop.f32.mrf.mxu2 }
 0x230   : > { %v3180_v11 = vpack.c.bf16 %v2193_v2, %v2192_v57  ;;  %v2524_v47 = vadd.f32 %v2523_v24, %v2493_v4  ;;  %v1945_v16 = vadd.f32 %v1944_v52, %v1856_v48  ;;  %v2033_v12 = vpop.f32.mrf.mxu3  ;;  %v4318_v52 = vld [vmem:[#allocation20_spill] sm:$0xff] }
 0x231   : > { %v1857_v23 = vpop.f32.mrf.mxu1 }
 0x232   : > { %3244 = vst [vmem:[%s4145_s9 + $0x18] sm:$0xff] %v3180_v11   ;;  %v2034_v62 = vadd.f32 %v2033_v12, %v1945_v16  ;;  %v1858_v63 = vadd.f32 %v1857_v23, %v4317_v34  ;;  %v334_v16 = vld [vmem:[%s3427_s16 + $0xd4] sm:$0x1] }
 0x233   : > { %v2124_v40 = vpop.f32.mrf.mxu0 }
 0x234   : > { %v2123_v61 = vadd.f32 %v2122_v21, %v2034_v62 }
 0x236   : > { %v2455_v46 = vadd.f32 %v2454_v51, %v2123_v61  ;;  %v2494_v20 = vmul.f32 %v2123_v61, %v2123_v61  ;;  %v2194_v13 = vadd.f32 %v4132_v14, %v2123_v61  ;;  %v775_v51 = vrot.slane %v4007_v50, 1 }
 0x237   : > { %v1946_v0 = vpop.f32.mrf.mxu2 }
 0x238   : > { %v2525_v30 = vadd.f32 %v2524_v47, %v2494_v20  ;;  %v1947_v54 = vadd.f32 %v1946_v0, %v1858_v63  ;;  %v2035_v10 = vpop.f32.mrf.mxu3  ;;  %v4319_v47 = vld [vmem:[#allocation21_spill] sm:$0xff]  ;;  %v786_v20 = vunpack.c.l.b16 %v334_v16 }
 0x239   : > { %v1860_v59 = vpop.f32.mrf.mxu1 }
 0x23a   : > { %v2036_v9 = vadd.f32 %v2035_v10, %v1947_v54  ;;  %v1861_v38 = vadd.f32 %v1860_v59, %v3994_v28  ;;  %v776_v28 = vrot.slane %v4319_v47, 1  ;;  %v787_v10 = vpack.c.b16 %v786_v20, %v786_v20 }
 0x23b   : > { %v2127_v1 = vpop.f32.mrf.mxu0 }
 0x23c   : > { %v2125_v44 = vadd.f32 %v2124_v40, %v2036_v9  ;;  %1899 = vmatmul.bf16.gmra.mxu1 %v4001_v7  ;;  %1988 = vmatmul.bf16.gmra.mxu2 %v3320_v36  ;;  %v777_v0 = vsel %vm688_vm1, %v775_v51, %v776_v28  ;;  %v802_v51 = vrot.slane %v787_v10, 1 }
 0x23d   : > { %2077 = vmatmul.bf16.gmra.mxu3 %v4004_v5 }
 0x23e   : > { %2166 = vmatmul.bf16.gmra.mxu0 %v4026_v22  ;;  %v2195_v39 = vadd.f32 %v4132_v14, %v2125_v44  ;;  %v2456_v24 = vadd.f32 %v2455_v46, %v2125_v44  ;;  %v2495_v58 = vmul.f32 %v2125_v44, %v2125_v44  ;;  %v3089_v46 = vld [vmem:[%s3427_s16 + $0xcc] sm:$0xff] }
 0x23f   : > { %v1949_v37 = vpop.f32.mrf.mxu2  ;;  %v791_v59 = vshll.u32 %v3089_v46, 16 }
 0x240   : > { %v3185_v17 = vpack.c.bf16 %v2195_v39, %v2194_v13  ;;  %v2526_v21 = vadd.f32 %v2525_v30, %v2495_v58  ;;  %v1950_v7 = vadd.f32 %v1949_v37, %v1861_v38  ;;  %v2038_v41 = vpop.f32.mrf.mxu3  ;;  %v789_v38 = vshrl.u32 %v3089_v46, 16 }
 0x241   : > { %v1862_v18 = vpop.f32.mrf.mxu1  ;;  %v793_v37 = vrot.slane %v791_v59, 1 }
 0x242   : > { %3245 = vst [vmem:[%s4145_s9 + $0x20] sm:$0xff] %v3185_v17   ;;  %v2039_v57 = vadd.f32 %v2038_v41, %v1950_v7  ;;  %v1863_v11 = vadd.f32 %v1862_v18, %v4318_v52  ;;  %v796_v17 = vshll.u32 %v787_v10, 16 }
 0x243   : > { %v2129_v2 = vpop.f32.mrf.mxu0  ;;  %v794_v41 = vor.u32 %v793_v37, %v789_v38 }
 0x244   : > { %v2128_v5 = vadd.f32 %v2127_v1, %v2039_v57  ;;  %v798_v18 = vrot.slane %v796_v17, 1  ;;  %v801_v57 = vrot.slane %v3089_v46, 1 }
 0x246   : > { %v2457_v4 = vadd.f32 %v2456_v24, %v2128_v5  ;;  %v2496_v48 = vmul.f32 %v2128_v5, %v2128_v5  ;;  %v2196_v54 = vadd.f32 %v4132_v14, %v2128_v5 }
 0x247   : > { %v1951_v12 = vpop.f32.mrf.mxu2 }
 0x248   : > { %v2527_v23 = vadd.f32 %v2526_v21, %v2496_v48  ;;  %v1952_v62 = vadd.f32 %v1951_v12, %v1863_v11  ;;  %v2040_v40 = vpop.f32.mrf.mxu3  ;;  %v799_v12 = vsel %vm479_vm0, %v794_v41, %v798_v18 }
 0x249   : > { %v1865_v61 = vpop.f32.mrf.mxu1 }
 0x24a   : > { %v2041_v34 = vadd.f32 %v2040_v40, %v1952_v62  ;;  %v1866_v36 = vadd.f32 %v1865_v61, %v4021_v32 }
 0x24b   : > { %v2132_v63 = vpop.f32.mrf.mxu0 }
 0x24c   : > { %v2130_v30 = vadd.f32 %v2129_v2, %v2041_v34  ;;  %1904 = vmatmul.bf16.gmra.mxu1 %v4026_v22  ;;  %1993 = vmatmul.bf16.gmra.mxu2 %v4007_v50 }
 0x24d   : > { %2082 = vmatmul.bf16.gmra.mxu3 %v4029_v56 }
 0x24e   : > { %2171 = vmatmul.bf16.gmra.mxu0 %v777_v0  ;;  %v2197_v9 = vadd.f32 %v4132_v14, %v2130_v30  ;;  %v2458_v1 = vadd.f32 %v2457_v4, %v2130_v30  ;;  %v2497_v44 = vmul.f32 %v2130_v30, %v2130_v30 }
 0x24f   : > { %v1954_v13 = vpop.f32.mrf.mxu2 }
 0x250   : > { %v3190_v39 = vpack.c.bf16 %v2197_v9, %v2196_v54  ;;  %v2528_v24 = vadd.f32 %v2527_v23, %v2497_v44  ;;  %v1955_v22 = vadd.f32 %v1954_v13, %v1866_v36  ;;  %v2043_v58 = vpop.f32.mrf.mxu3  ;;  %v803_v23 = vsel %vm688_vm1, %v801_v57, %v802_v51 }
 0x251   : > { %v1867_v50 = vpop.f32.mrf.mxu1 }
 0x252   : > { %3246 = vst [vmem:[%s4145_s9 + $0x28] sm:$0xff] %v3190_v39   ;;  %v2044_v56 = vadd.f32 %v2043_v58, %v1955_v22  ;;  %v1868_v32 = vadd.f32 %v1867_v50, %v4033_v60 }
 0x253   : > { %v2134_v21 = vpop.f32.mrf.mxu0 }
 0x254   : > { %v2133_v7 = vadd.f32 %v2132_v63, %v2044_v56 }
 0x256   : > { %v2459_v2 = vadd.f32 %v2458_v1, %v2133_v7  ;;  %v2498_v5 = vmul.f32 %v2133_v7, %v2133_v7  ;;  %v2198_v40 = vadd.f32 %v4132_v14, %v2133_v7 }
 0x257   : > { %v1956_v4 = vpop.f32.mrf.mxu2 }
 0x258   : > { %v2529_v48 = vadd.f32 %v2528_v24, %v2498_v5  ;;  %v1957_v52 = vadd.f32 %v1956_v4, %v1868_v32  ;;  %v2045_v11 = vpop.f32.mrf.mxu3 }
 0x259   : > { %v1870_v47 = vpop.f32.mrf.mxu1 }
 0x25a   : > { %v2046_v28 = vadd.f32 %v2045_v11, %v1957_v52  ;;  %v1871_v34 = vadd.f32 %v1870_v47, %v4038_v29 }
 0x25b   : > { %v2137_v16 = vpop.f32.mrf.mxu0 }
 0x25c   : > { %v2135_v62 = vadd.f32 %v2134_v21, %v2046_v28  ;;  %1909 = vmatmul.bf16.gmra.mxu1 %v777_v0  ;;  %1998 = vmatmul.bf16.gmra.mxu2 %v3089_v46 }
 0x25d   : > { %2087 = vmatmul.bf16.gmra.mxu3 %v799_v12 }
 0x25e   : > { %2176 = vmatmul.bf16.gmra.mxu0 %v803_v23  ;;  %v2199_v60 = vadd.f32 %v4132_v14, %v2135_v62  ;;  %v2460_v61 = vadd.f32 %v2459_v2, %v2135_v62  ;;  %v2499_v20 = vmul.f32 %v2135_v62, %v2135_v62 }
 0x25f   : > { %v1959_v63 = vpop.f32.mrf.mxu2 }
 0x260   : > { %v3195_v30 = vpack.c.bf16 %v2199_v60, %v2198_v40  ;;  %v2530_v54 = vadd.f32 %v2529_v48, %v2499_v20  ;;  %v1960_v10 = vadd.f32 %v1959_v63, %v1871_v34  ;;  %v2048_v59 = vpop.f32.mrf.mxu3 }
 0x261   : > { %v1872_v9 = vpop.f32.mrf.mxu1 }
 0x262   : > { %3247 = vst [vmem:[%s4145_s9 + $0x30] sm:$0xff] %v3195_v30   ;;  %v2049_v1 = vadd.f32 %v2048_v59, %v1960_v10  ;;  %v1873_v13 = vadd.f32 %v1872_v9, %v4043_v15 }
 0x263   : > { %v2139_v0 = vpop.f32.mrf.mxu0 }
 0x264   : > { %v2138_v46 = vadd.f32 %v2137_v16, %v2049_v1 }
 0x266   : > { %v2461_v44 = vadd.f32 %v2460_v61, %v2138_v46  ;;  %v2500_v36 = vmul.f32 %v2138_v46, %v2138_v46  ;;  %v2200_v17 = vadd.f32 %v4132_v14, %v2138_v46 }
 0x267   : > { %v1961_v39 = vpop.f32.mrf.mxu2 }
 0x268   : > { %v2531_v24 = vadd.f32 %v2530_v54, %v2500_v36  ;;  %v1962_v22 = vadd.f32 %v1961_v39, %v1873_v13  ;;  %v2050_v58 = vpop.f32.mrf.mxu3 }
 0x269   : > { %v1875_v29 = vpop.f32.mrf.mxu1 }
 0x26a   : > { %v2051_v50 = vadd.f32 %v2050_v58, %v1962_v22  ;;  %v1876_v41 = vadd.f32 %v1875_v29, %v4048_v33 }
 0x26b   : > { %v2142_v38 = vpop.f32.mrf.mxu0 }
 0x26c   : > { %v2140_v37 = vadd.f32 %v2139_v0, %v2051_v50 }
 0x26e   : > { %v2201_v56 = vadd.f32 %v4132_v14, %v2140_v37  ;;  %v2462_v21 = vadd.f32 %v2461_v44, %v2140_v37  ;;  %v2501_v7 = vmul.f32 %v2140_v37, %v2140_v37 }
 0x26f   : > { %v1964_v18 = vpop.f32.mrf.mxu2 }
 0x270   : > { %v3200_v57 = vpack.c.bf16 %v2201_v56, %v2200_v17  ;;  %v2532_v15 = vadd.f32 %v2531_v24, %v2501_v7  ;;  %v1965_v2 = vadd.f32 %v1964_v18, %v1876_v41  ;;  %v2053_v5 = vpop.f32.mrf.mxu3 }
 0x271   : > { %v1877_v32 = vpop.f32.mrf.mxu1 }
 0x272   : > { %3248 = vst [vmem:[%s4145_s9 + $0x38] sm:$0xff] %v3200_v57   ;;  %v2054_v51 = vadd.f32 %v2053_v5, %v1965_v2  ;;  %v1878_v47 = vadd.f32 %v1877_v32, %v4053_v27 }
 0x273   : > { %v2144_v4 = vpop.f32.mrf.mxu0 }
 0x274   : > { %v2143_v48 = vadd.f32 %v2142_v38, %v2054_v51 }
 0x276   : > { %v2463_v52 = vadd.f32 %v2462_v21, %v2143_v48  ;;  %v2502_v11 = vmul.f32 %v2143_v48, %v2143_v48  ;;  %v2202_v61 = vadd.f32 %v4132_v14, %v2143_v48 }
 0x277   : > { %v1966_v28 = vpop.f32.mrf.mxu2 }
 0x278   : > { %v2533_v16 = vadd.f32 %v2532_v15, %v2502_v11  ;;  %v1967_v12 = vadd.f32 %v1966_v28, %v1878_v47  ;;  %v2055_v23 = vpop.f32.mrf.mxu3 }
 0x279   : > { %v1880_v33 = vpop.f32.mrf.mxu1 }
 0x27a   : > { %v2056_v62 = vadd.f32 %v2055_v23, %v1967_v12  ;;  %v1881_v30 = vadd.f32 %v1880_v33, %v4058_v25 }
 0x27b   : > { %v2147_v40 = vpop.f32.mrf.mxu0 }
 0x27c   : > { %v2145_v60 = vadd.f32 %v2144_v4, %v2056_v62 }
 0x27e   : > { %v2203_v20 = vadd.f32 %v4132_v14, %v2145_v60  ;;  %v2464_v34 = vadd.f32 %v2463_v52, %v2145_v60  ;;  %v2503_v63 = vmul.f32 %v2145_v60, %v2145_v60 }
 0x27f   : > { %v1969_v54 = vpop.f32.mrf.mxu2 }
 0x280   : > { %v3205_v10 = vpack.c.bf16 %v2203_v20, %v2202_v61  ;;  %v2534_v27 = vadd.f32 %v2533_v16, %v2503_v63  ;;  %v1970_v59 = vadd.f32 %v1969_v54, %v1881_v30  ;;  %v2058_v9 = vpop.f32.mrf.mxu3 }
 0x281   : > { %v1882_v1 = vpop.f32.mrf.mxu1 }
 0x282   : > { %3249 = vst [vmem:[%s4145_s9 + $0x40] sm:$0xff] %v3205_v10   ;;  %v2059_v0 = vadd.f32 %v2058_v9, %v1970_v59  ;;  %v1883_v39 = vadd.f32 %v1882_v1, %v4063_v45 }
 0x283   : > { %v2149_v46 = vpop.f32.mrf.mxu0 }
 0x284   : > { %v2148_v44 = vadd.f32 %v2147_v40, %v2059_v0 }
 0x286   : > { %v2465_v36 = vadd.f32 %v2464_v34, %v2148_v44  ;;  %v2504_v13 = vmul.f32 %v2148_v44, %v2148_v44  ;;  %v2204_v17 = vadd.f32 %v4132_v14, %v2148_v44 }
 0x287   : > { %v1971_v24 = vpop.f32.mrf.mxu2 }
 0x288   : > { %v2535_v22 = vadd.f32 %v2534_v27, %v2504_v13  ;;  %v1972_v58 = vadd.f32 %v1971_v24, %v1883_v39  ;;  %v2060_v29 = vpop.f32.mrf.mxu3 }
 0x289   : > { %v1885_v25 = vpop.f32.mrf.mxu1 }
 0x28a   : > { %v2061_v50 = vadd.f32 %v2060_v29, %v1972_v58  ;;  %v1886_v41 = vadd.f32 %v1885_v25, %v4068_v35 }
 0x28b   : > { %v2152_v38 = vpop.f32.mrf.mxu0 }
 0x28c   : > { %v2150_v37 = vadd.f32 %v2149_v46, %v2061_v50 }
 0x28e   : > { %v2205_v56 = vadd.f32 %v4132_v14, %v2150_v37  ;;  %v2466_v21 = vadd.f32 %v2465_v36, %v2150_v37  ;;  %v2505_v7 = vmul.f32 %v2150_v37, %v2150_v37 }
 0x28f   : > { %v1974_v18 = vpop.f32.mrf.mxu2 }
 0x290   : > { %v3210_v57 = vpack.c.bf16 %v2205_v56, %v2204_v17  ;;  %v2536_v45 = vadd.f32 %v2535_v22, %v2505_v7  ;;  %v1975_v15 = vadd.f32 %v1974_v18, %v1886_v41  ;;  %v2063_v2 = vpop.f32.mrf.mxu3 }
 0x291   : > { %v1887_v5 = vpop.f32.mrf.mxu1 }
 0x292   : > { %3250 = vst [vmem:[%s4145_s9 + $0x48] sm:$0xff] %v3210_v57   ;;  %v2064_v32 = vadd.f32 %v2063_v2, %v1975_v15  ;;  %v1888_v11 = vadd.f32 %v1887_v5, %v4073_v8 }
 0x293   : > { %v2154_v51 = vpop.f32.mrf.mxu0 }
 0x294   : > { %v2153_v4 = vadd.f32 %v2152_v38, %v2064_v32 }
 0x296   : > { %v2467_v48 = vadd.f32 %v2466_v21, %v2153_v4  ;;  %v2506_v52 = vmul.f32 %v2153_v4, %v2153_v4  ;;  %v2206_v40 = vadd.f32 %v4132_v14, %v2153_v4 }
 0x297   : > { %v1976_v47 = vpop.f32.mrf.mxu2 }
 0x298   : > { %v2537_v28 = vadd.f32 %v2536_v45, %v2506_v52  ;;  %v1977_v16 = vadd.f32 %v1976_v47, %v1888_v11  ;;  %v2065_v12 = vpop.f32.mrf.mxu3 }
 0x299   : > { %v1890_v35 = vpop.f32.mrf.mxu1 }
 0x29a   : > { %v2066_v23 = vadd.f32 %v2065_v12, %v1977_v16  ;;  %v1891_v34 = vadd.f32 %v1890_v35, %v4078_v31 }
 0x29b   : > { %v2157_v33 = vpop.f32.mrf.mxu0 }
 0x29c   : > { %v2155_v62 = vadd.f32 %v2154_v51, %v2066_v23 }
 0x29e   : > { %v2207_v60 = vadd.f32 %v4132_v14, %v2155_v62  ;;  %v2468_v61 = vadd.f32 %v2467_v48, %v2155_v62  ;;  %v2507_v20 = vmul.f32 %v2155_v62, %v2155_v62 }
 0x29f   : > { %v1979_v63 = vpop.f32.mrf.mxu2 }
 0x2a0   : > { %v3215_v30 = vpack.c.bf16 %v2207_v60, %v2206_v40  ;;  %v2538_v8 = vadd.f32 %v2537_v28, %v2507_v20  ;;  %v1980_v54 = vadd.f32 %v1979_v63, %v1891_v34  ;;  %v2068_v10 = vpop.f32.mrf.mxu3 }
 0x2a1   : > { %v1892_v27 = vpop.f32.mrf.mxu1 }
 0x2a2   : > { %3251 = vst [vmem:[%s4145_s9 + $0x50] sm:$0xff] %v3215_v30   ;;  %v2069_v59 = vadd.f32 %v2068_v10, %v1980_v54  ;;  %v1893_v44 = vadd.f32 %v1892_v27, %v4083_v3 }
 0x2a3   : > { %v2159_v9 = vpop.f32.mrf.mxu0 }
 0x2a4   : > { %v2158_v1 = vadd.f32 %v2157_v33, %v2069_v59 }
 0x2a6   : > { %v2469_v0 = vadd.f32 %v2468_v61, %v2158_v1  ;;  %v2508_v46 = vmul.f32 %v2158_v1, %v2158_v1  ;;  %v2208_v25 = vadd.f32 %v4132_v14, %v2158_v1 }
 0x2a7   : > { %v1981_v36 = vpop.f32.mrf.mxu2 }
 0x2a8   : > { %v2539_v13 = vadd.f32 %v2538_v8, %v2508_v46  ;;  %v1982_v39 = vadd.f32 %v1981_v36, %v1893_v44  ;;  %v2070_v24 = vpop.f32.mrf.mxu3 }
 0x2a9   : > { %v1895_v31 = vpop.f32.mrf.mxu1 }
 0x2aa   : > { %v2071_v22 = vadd.f32 %v2070_v24, %v1982_v39  ;;  %v1896_v17 = vadd.f32 %v1895_v31, %v4088_v26 }
 0x2ab   : > { %v2162_v58 = vpop.f32.mrf.mxu0 }
 0x2ac   : > { %v2160_v29 = vadd.f32 %v2159_v9, %v2071_v22 }
 0x2ae   : > { %v2209_v50 = vadd.f32 %v4132_v14, %v2160_v29  ;;  %v2470_v38 = vadd.f32 %v2469_v0, %v2160_v29  ;;  %v2509_v37 = vmul.f32 %v2160_v29, %v2160_v29 }
 0x2af   : > { %v1984_v56 = vpop.f32.mrf.mxu2 }
 0x2b0   : > { %v3220_v21 = vpack.c.bf16 %v2209_v50, %v2208_v25  ;;  %v2540_v3 = vadd.f32 %v2539_v13, %v2509_v37  ;;  %v1985_v7 = vadd.f32 %v1984_v56, %v1896_v17  ;;  %v2073_v41 = vpop.f32.mrf.mxu3 }
 0x2b1   : > { %v1897_v18 = vpop.f32.mrf.mxu1 }
 0x2b2   : > { %3252 = vst [vmem:[%s4145_s9 + $0x58] sm:$0xff] %v3220_v21   ;;  %v2074_v57 = vadd.f32 %v2073_v41, %v1985_v7  ;;  %v1898_v32 = vadd.f32 %v1897_v18, %v4093_v55 }
 0x2b3   : > { %v2164_v45 = vpop.f32.mrf.mxu0 }
 0x2b4   : > { %v2163_v15 = vadd.f32 %v2162_v58, %v2074_v57 }
 0x2b6   : > { %v2471_v2 = vadd.f32 %v2470_v38, %v2163_v15  ;;  %v2510_v5 = vmul.f32 %v2163_v15, %v2163_v15  ;;  %v2210_v16 = vadd.f32 %v4132_v14, %v2163_v15 }
 0x2b7   : > { %v1986_v51 = vpop.f32.mrf.mxu2 }
 0x2b8   : > { %v2541_v4 = vadd.f32 %v2540_v3, %v2510_v5  ;;  %v1987_v48 = vadd.f32 %v1986_v51, %v1898_v32  ;;  %v2075_v52 = vpop.f32.mrf.mxu3 }
 0x2b9   : > { %v1900_v26 = vpop.f32.mrf.mxu1 }
 0x2ba   : > { %v2076_v11 = vadd.f32 %v2075_v52, %v1987_v48  ;;  %v1901_v33 = vadd.f32 %v1900_v26, %v4098_v49 }
 0x2bb   : > { %v2167_v47 = vpop.f32.mrf.mxu0 }
 0x2bc   : > { %v2165_v28 = vadd.f32 %v2164_v45, %v2076_v11 }
 0x2be   : > { %v2211_v12 = vadd.f32 %v4132_v14, %v2165_v28  ;;  %v2472_v35 = vadd.f32 %v2471_v2, %v2165_v28  ;;  %v2511_v23 = vmul.f32 %v2165_v28, %v2165_v28 }
 0x2bf   : > { %v1989_v62 = vpop.f32.mrf.mxu2 }
 0x2c0   : > { %v3225_v40 = vpack.c.bf16 %v2211_v12, %v2210_v16  ;;  %v2542_v55 = vadd.f32 %v2541_v4, %v2511_v23  ;;  %v1990_v60 = vadd.f32 %v1989_v62, %v1901_v33  ;;  %v2078_v61 = vpop.f32.mrf.mxu3 }
 0x2c1   : > { %v1902_v20 = vpop.f32.mrf.mxu1 }
 0x2c2   : > { %3253 = vst [vmem:[%s4145_s9 + $0x60] sm:$0xff] %v3225_v40   ;;  %v2079_v34 = vadd.f32 %v2078_v61, %v1990_v60  ;;  %v1903_v10 = vadd.f32 %v1902_v20, %v4103_v19 }
 0x2c3   : > { %v2169_v63 = vpop.f32.mrf.mxu0 }
 0x2c4   : > { %v2168_v30 = vadd.f32 %v2167_v47, %v2079_v34 }
 0x2c6   : > { %v2473_v8 = vadd.f32 %v2472_v35, %v2168_v30  ;;  %v2512_v54 = vmul.f32 %v2168_v30, %v2168_v30  ;;  %v2212_v44 = vadd.f32 %v4132_v14, %v2168_v30 }
 0x2c7   : > { %v1991_v27 = vpop.f32.mrf.mxu2 }
 0x2c8   : > { %v2543_v59 = vadd.f32 %v2542_v55, %v2512_v54  ;;  %v1992_v9 = vadd.f32 %v1991_v27, %v1903_v10  ;;  %v2080_v1 = vpop.f32.mrf.mxu3 }
 0x2c9   : > { %v1905_v49 = vpop.f32.mrf.mxu1 }
 0x2ca   : > { %v2081_v0 = vadd.f32 %v2080_v1, %v1992_v9  ;;  %v1906_v31 = vadd.f32 %v1905_v49, %v4108_v53 }
 0x2cb   : > { %v2172_v36 = vpop.f32.mrf.mxu0 }
 0x2cc   : > { %v2170_v46 = vadd.f32 %v2169_v63, %v2081_v0 }
 0x2ce   : > { %v2213_v13 = vadd.f32 %v4132_v14, %v2170_v46  ;;  %v2474_v39 = vadd.f32 %v2473_v8, %v2170_v46  ;;  %v2513_v24 = vmul.f32 %v2170_v46, %v2170_v46 }
 0x2cf   : > { %v1994_v22 = vpop.f32.mrf.mxu2 }
 0x2d0   : > { %v3230_v58 = vpack.c.bf16 %v2213_v13, %v2212_v44  ;;  %v2544_v19 = vadd.f32 %v2543_v59, %v2513_v24  ;;  %v1995_v29 = vadd.f32 %v1994_v22, %v1906_v31  ;;  %v2083_v25 = vpop.f32.mrf.mxu3 }
 0x2d1   : > { %v1907_v50 = vpop.f32.mrf.mxu1 }
 0x2d2   : > { %3254 = vst [vmem:[%s4145_s9 + $0x68] sm:$0xff] %v3230_v58   ;;  %v2084_v38 = vadd.f32 %v2083_v25, %v1995_v29  ;;  %v1908_v21 = vadd.f32 %v1907_v50, %v4113_v43 }
 0x2d3   : > { %v2174_v3 = vpop.f32.mrf.mxu0 }
 0x2d4   : > { %v2173_v37 = vadd.f32 %v2172_v36, %v2084_v38 }
 0x2d6   : > { %v2475_v17 = vadd.f32 %v2474_v39, %v2173_v37  ;;  %v2514_v56 = vmul.f32 %v2173_v37, %v2173_v37  ;;  %v2214_v2 = vadd.f32 %v4132_v14, %v2173_v37 }
 0x2d7   : > { %v1996_v7 = vpop.f32.mrf.mxu2 }
 0x2d8   : > { %v2545_v41 = vadd.f32 %v2544_v19, %v2514_v56  ;;  %v1997_v18 = vadd.f32 %v1996_v7, %v1908_v21  ;;  %v2085_v57 = vpop.f32.mrf.mxu3 }
 0x2d9   : > { %v1910_v53 = vpop.f32.mrf.mxu1 }
 0x2da   : > { %v2086_v45 = vadd.f32 %v2085_v57, %v1997_v18  ;;  %v1911_v4 = vadd.f32 %v1910_v53, %v4118_v6 }
 0x2db   : > { %v2177_v47 = vpop.f32.mrf.mxu0 }
 0x2dc   : > { %v2175_v15 = vadd.f32 %v2174_v3, %v2086_v45 }
 0x2de   : > { %v2215_v5 = vadd.f32 %v4132_v14, %v2175_v15  ;;  %v2476_v32 = vadd.f32 %v2475_v17, %v2175_v15  ;;  %v2515_v51 = vmul.f32 %v2175_v15, %v2175_v15 }
 0x2df   : > { %v1999_v48 = vpop.f32.mrf.mxu2 }
 0x2e0   : > { %v3235_v52 = vpack.c.bf16 %v2215_v5, %v2214_v2  ;;  %v2546_v43 = vadd.f32 %v2545_v41, %v2515_v51  ;;  %v2000_v26 = vadd.f32 %v1999_v48, %v1911_v4  ;;  %v2088_v11 = vpop.f32.mrf.mxu3 }
 0x2e1   : > { %v1912_v16 = vpop.f32.mrf.mxu1 }
 0x2e2   : > { %3255 = vst [vmem:[%s4145_s9 + $0x70] sm:$0xff] %v3235_v52   ;;  %v2089_v28 = vadd.f32 %v2088_v11, %v2000_v26  ;;  %v1913_v33 = vadd.f32 %v1912_v16, %v4123_v42 }
 0x2e3   : > { %v2179_v61 = vpop.f32.mrf.mxu0 }
 0x2e4   : > { %v2178_v12 = vadd.f32 %v2177_v47, %v2089_v28 }
 0x2e6   : > { %v2477_v35 = vadd.f32 %v2476_v32, %v2178_v12  ;;  %v2516_v23 = vmul.f32 %v2178_v12, %v2178_v12  ;;  %v2216_v34 = vadd.f32 %v4132_v14, %v2178_v12 }
 0x2e7   : > { %v2001_v62 = vpop.f32.mrf.mxu2 }
 0x2e8   : > { %v2547_v40 = vadd.f32 %v2546_v43, %v2516_v23  ;;  %v2002_v55 = vadd.f32 %v2001_v62, %v1913_v33  ;;  %v2090_v60 = vpop.f32.mrf.mxu3 }
 0x2ea   : > { %v2091_v6 = vadd.f32 %v2090_v60, %v2002_v55 }
 0x2ec   : > { %v2180_v20 = vadd.f32 %v2179_v61, %v2091_v6 }
 0x2ee   : > { %v2217_v63 = vadd.f32 %v4132_v14, %v2180_v20  ;;  %v2478_v30 = vadd.f32 %v2477_v35, %v2180_v20  ;;  %v2517_v8 = vmul.f32 %v2180_v20, %v2180_v20 }
 0x2f0   : > { %v3240_v54 = vpack.c.bf16 %v2217_v63, %v2216_v34  ;;  %v2479_v10 = vrot.slane %v2478_v30, 4  ;;  %v2548_v27 = vadd.f32 %v2547_v40, %v2517_v8 }
 0x2f2   : > { %3256 = vst [vmem:[%s4145_s9 + $0x78] sm:$0xff] %v3240_v54   ;;  %v2480_v42 = vadd.f32 %v2479_v10, %v2478_v30  ;;  %v2549_v59 = vrot.slane %v2548_v27, 4 }
 0x2f4   : > { %v2481_v9 = vrot.slane %v2480_v42, 2  ;;  %v2550_v1 = vadd.f32 %v2549_v59, %v2548_v27 }
 0x2f6   : > { %v2482_v49 = vadd.f32 %v2481_v9, %v2480_v42  ;;  %v2551_v0 = vrot.slane %v2550_v1, 2 }
 0x2f8   : > { %v2483_v46 = vrot.slane %v2482_v49, 1  ;;  %v2552_v44 = vadd.f32 %v2551_v0, %v2550_v1 }
 0x2fa   : > { %v2484_v14 = vadd.f32 %v2483_v46, %v2482_v49  ;;  %v2553_v36 = vrot.slane %v2552_v44, 1 }
 0x2fc   : > { %2485 = vst [vmem:[%s270_s11] sm:$0x1] %v2484_v14  ;;  %v2554_v13 = vadd.f32 %v2553_v36, %v2552_v44 }
 0x2fe   : > { %2555 = vst [vmem:[%s275_s14] sm:$0x1] %v2554_v13 }
 0x2ff PF: > { %s16_s20 = sadd.s32 1, %s3343_s20   ;;  %s4320_s18 = smov %s3339_s19 }
 0x300   : > { %p13_p5 = scmp.ge.s32.totalorder %s16_s20, 4   ;;  %s4321_s19 = smov %s4323_s21 }
 0x302   :  { %15 = sbr.rel (!%p13_p5) target bundleno = 2 (0x2), region = 87 }

</bundles_post_ra>
